<compile_context>
chip_gen: v7x
topology: tpu7x:2x2x1
jax: 0.10.0
libtpu: 0.0.40
codegen_flags: <defaults>
</compile_context>

<pallas_src>
import functools

import jax
import jax.numpy as jnp
import numpy as np
from jax.experimental import pallas as pl
from jax.experimental.pallas import tpu as pltpu


def _attention_kernel(
    x_ref,      # (T, dim)        T = batch_block * seq_len tokens, bf16
    wqkv_ref,   # (dim, 3*inner)  fused qkv weight (softmax scale folded into q cols), bf16
    wo_ref,     # (inner, dim)    output projection weight, bf16
    bo_ref,     # (1, dim)        output projection bias, f32
    o_ref,      # (T, dim)        output tokens
    *,
    heads: int,
    dim_head: int,
    batch_block: int,
    seq_len: int,
):
    inner = heads * dim_head

    # --- fused QKV projection: one lane-dense (T,dim)@(dim,3*inner) bf16 MXU matmul ---
    qkv = jnp.dot(x_ref[...], wqkv_ref[...],
                  preferred_element_type=jnp.float32)              # (T, 3*inner) f32
    qkv = qkv.reshape(batch_block, seq_len, 3 * inner)             # (Bblk, N, 3*inner)

    # --- per-head attention; N is tiny so the full (N, N) score block is fine ---
    ctx_heads = []
    for h in range(heads):
        lo = h * dim_head
        q = qkv[:, :, lo:lo + dim_head].astype(jnp.bfloat16)                   # scale pre-folded
        k = qkv[:, :, inner + lo:inner + lo + dim_head].astype(jnp.bfloat16)
        v = qkv[:, :, 2 * inner + lo:2 * inner + lo + dim_head].astype(jnp.bfloat16)

        s = jnp.einsum("bqd,bkd->bqk", q, k,
                       preferred_element_type=jnp.float32)                     # (Bblk, N, N) f32
        # softmax kept entirely in f32 (v5e has no bf16 VPU/EUP)
        s = s - jnp.max(s, axis=-1, keepdims=True)
        e = jnp.exp(s)
        denom = jnp.sum(e, axis=-1, keepdims=True)
        p = e * pl.reciprocal(denom, approx=True)    # EUP reciprocal; Newton step dropped
        ctx_heads.append(
            jnp.einsum("bqk,bkd->bqd", p.astype(jnp.bfloat16), v,
                       preferred_element_type=jnp.float32))                    # (Bblk, N, dh)

    # --- fused output projection: lane-dense (T, inner) slab, single K=inner matmul ---
    ctx = jnp.concatenate(ctx_heads, axis=-1)                                  # (Bblk, N, inner)
    ctx = ctx.reshape(batch_block * seq_len, inner).astype(jnp.bfloat16)       # (T, inner)
    out = jnp.dot(ctx, wo_ref[...], preferred_element_type=jnp.float32)        # (T, dim) f32
    o_ref[...] = (out + bo_ref[...]).astype(o_ref.dtype)


def _choose_batch_block(B, N, max_tokens=512):
    """Largest divisor of B that (a) keeps >= 2 parallel grid steps when B >= 2
    (v7x has 2 TensorCores/chip) and (b) stays within a modest per-step token budget."""
    best = 1
    for d in range(1, B + 1):
        if B % d != 0:
            continue
        if d * N > max_tokens:
            continue
        if B >= 2 and B // d < 2:
            continue
        best = d
    return best


def attention_pallas(x, params, *, heads, dim_head, batch_block=None):
    """x: (B, N, dim) f32; params: PyTorch-layout weights (see make_params)."""
    B, N, dim = x.shape
    inner = heads * dim_head
    scale = float(dim_head) ** -0.5
    out_dtype = x.dtype

    # --- one-time layout transform of the PyTorch weights (lane-dense, bf16) ---
    w_qkv_t = params["w_qkv"].T                                # (dim, 3*inner)
    wq_t, wk_t, wv_t = jnp.split(w_qkv_t, 3, axis=-1)
    # Fold the softmax scale into Wq (bias-free Linear => exact rewrite).
    wqkv = jnp.concatenate([wq_t * scale, wk_t, wv_t], axis=-1).astype(jnp.bfloat16)
    wo = params["w_out"].T.astype(jnp.bfloat16)                # (inner, dim)
    bo = params["b_out"].reshape(1, dim).astype(jnp.float32)

    if batch_block is None:
        batch_block = _choose_batch_block(B, N)
    assert B % batch_block == 0, "batch_block must divide B"
    grid = (B // batch_block,)
    tokens = batch_block * N

    # Flatten to a token-major slab: matmuls see 2-D lane-dense tiles, and the
    # output store is a plain unmasked vst over (tokens, dim).
    x_flat = x.reshape(B * N, dim).astype(jnp.bfloat16)

    kernel = functools.partial(
        _attention_kernel, heads=heads, dim_head=dim_head,
        batch_block=batch_block, seq_len=N,
    )

    out_flat = pl.pallas_call(
        kernel,
        out_shape=jax.ShapeDtypeStruct((B * N, dim), out_dtype),
        grid_spec=pltpu.PrefetchScalarGridSpec(
            num_scalar_prefetch=0,
            grid=grid,
            in_specs=[
                pl.BlockSpec((tokens, dim), lambda g: (g, 0)),          # x tokens
                pl.BlockSpec((dim, 3 * inner), lambda g: (0, 0)),       # fused qkv weight
                pl.BlockSpec((inner, dim), lambda g: (0, 0)),           # output weight
                pl.BlockSpec((1, dim), lambda g: (0, 0)),               # output bias
            ],
            out_specs=pl.BlockSpec((tokens, dim), lambda g: (g, 0)),
        ),
        compiler_params=pltpu.CompilerParams(
            dimension_semantics=("parallel",),
        ),
    )(x_flat, wqkv, wo, bo)
    return out_flat.reshape(B, N, dim)


def attention_reference(x, params, *, heads, dim_head):
    """Pure-JAX f32 reference mirroring the PyTorch forward."""
    B, N, dim = x.shape
    inner = heads * dim_head
    qkv = x @ params["w_qkv"].T                                # (B, N, 3*inner)
    q, k, v = jnp.split(qkv, 3, axis=-1)

    def split_heads(t):
        return t.reshape(B, N, heads, dim_head).transpose(0, 2, 1, 3)  # (B, H, N, dh)

    q, k, v = map(split_heads, (q, k, v))
    dots = jnp.einsum("bhqd,bhkd->bhqk", q, k) * (float(dim_head) ** -0.5)
    attn = jax.nn.softmax(dots, axis=-1)
    out = jnp.einsum("bhqk,bhkd->bhqd", attn, v)
    out = out.transpose(0, 2, 1, 3).reshape(B, N, inner)
    return out @ params["w_out"].T + params["b_out"]           # Dropout(0.0) == identity


def make_params(key, dim, heads, dim_head):
    """Deterministic synthetic init, PyTorch weight layout."""
    inner = heads * dim_head
    k1, k2, k3 = jax.random.split(key, 3)
    s = 0.05
    w_qkv = jax.random.normal(k1, (3 * inner, dim), jnp.float32) * s   # to_qkv.weight
    project_out = not (heads == 1 and dim_head == dim)
    if project_out:
        w_out = jax.random.normal(k2, (dim, inner), jnp.float32) * s   # to_out[0].weight
        b_out = jax.random.normal(k3, (dim,), jnp.float32) * s         # to_out[0].bias
    else:
        # to_out == nn.Identity(): equivalent to eye weight + zero bias
        w_out = jnp.eye(dim, dtype=jnp.float32)
        b_out = jnp.zeros((dim,), jnp.float32)
    return {"w_qkv": w_qkv, "w_out": w_out, "b_out": b_out}


if __name__ == "__main__":
    # inner_dim = heads * dim_head = 128 -> lane-dense fused weights & output.
    B, N, DIM, HEADS, DIM_HEAD = 8, 8, 128, 4, 32

    key = jax.random.PRNGKey(0)
    k_x, k_p = jax.random.split(key)
    x = jax.random.normal(k_x, (B, N, DIM), jnp.float32)
    params = make_params(k_p, DIM, HEADS, DIM_HEAD)

    out = attention_pallas(x, params, heads=HEADS, dim_head=DIM_HEAD)
    out = jax.block_until_ready(out)

    ref = attention_reference(x, params, heads=HEADS, dim_head=DIM_HEAD)
    # matmul operands are bf16 (f32 accumulation & f32 softmax) -> compare at bf16-level tolerance
    np.testing.assert_allclose(np.asarray(out), np.asarray(ref), rtol=2e-2, atol=2e-2)

    print("KERNEL_OK")
</pallas_src>

<mosaic_0001>
module attributes {stable_mosaic.version = 11 : i64} {
  func.func @_attention_kernel(%arg0: i32, %arg1: memref<32x128xbf16, #tpu.memory_space<vmem>>, %arg2: memref<128x384xbf16, #tpu.memory_space<vmem>>, %arg3: memref<128x128xbf16, #tpu.memory_space<vmem>>, %arg4: memref<1x128xf32, #tpu.memory_space<vmem>>, %arg5: memref<32x128xf32, #tpu.memory_space<vmem>>) attributes {dimension_semantics = [#tpu.dimension_semantics<parallel>], iteration_bounds = array<i64: 2>, scalar_prefetch = 0 : i64, scratch_operands = 0 : i64, tpu.core_type = #tpu.core_type<tc>, window_params = [{transform_indices = @transform_0, window_bounds = array<i64: 32, 128>}, {pipeline_mode = #tpu.pipeline_mode<synchronous>, transform_indices = @transform_1, window_bounds = array<i64: 128, 384>}, {pipeline_mode = #tpu.pipeline_mode<synchronous>, transform_indices = @transform_2, window_bounds = array<i64: 128, 128>}, {pipeline_mode = #tpu.pipeline_mode<synchronous>, transform_indices = @transform_3, window_bounds = array<i64: 1, 128>}, {transform_indices = @transform_4, window_bounds = array<i64: 32, 128>}]} {
    %c0 = arith.constant 0 : index
    %c0_0 = arith.constant 0 : index
    %0 = vector.load %arg1[%c0, %c0_0] : memref<32x128xbf16, #tpu.memory_space<vmem>>, vector<32x128xbf16>
    %c0_1 = arith.constant 0 : index
    %c0_2 = arith.constant 0 : index
    %1 = vector.load %arg2[%c0_1, %c0_2] : memref<128x384xbf16, #tpu.memory_space<vmem>>, vector<128x384xbf16>
    %cst = arith.constant dense<0.000000e+00> : vector<32x384xf32>
    %2 = tpu.matmul %0, %1, %cst {dimension_numbers = #tpu.dot_dimension_numbers<[1], [0], [0], [1], [0, 0, 1, 1], [], []>} : vector<32x128xbf16>, vector<128x384xbf16>, vector<32x384xf32> -> vector<32x384xf32>
    %3 = vector.shape_cast %2 : vector<32x384xf32> to vector<4x8x384xf32>
    %4 = vector.extract_strided_slice %3 {offsets = [0, 0, 0], sizes = [4, 8, 32], strides = [1, 1, 1]} : vector<4x8x384xf32> to vector<4x8x32xf32>
    %5 = arith.truncf %4 : vector<4x8x32xf32> to vector<4x8x32xbf16>
    %6 = vector.extract_strided_slice %3 {offsets = [0, 0, 128], sizes = [4, 8, 32], strides = [1, 1, 1]} : vector<4x8x384xf32> to vector<4x8x32xf32>
    %7 = arith.truncf %6 : vector<4x8x32xf32> to vector<4x8x32xbf16>
    %8 = vector.extract_strided_slice %3 {offsets = [0, 0, 256], sizes = [4, 8, 32], strides = [1, 1, 1]} : vector<4x8x384xf32> to vector<4x8x32xf32>
    %9 = arith.truncf %8 : vector<4x8x32xf32> to vector<4x8x32xbf16>
    "tpu.trace_start"() <{level = 10 : i32, message = "bqd,bkd->bqk"}> : () -> ()
    %cst_3 = arith.constant dense<0.000000e+00> : vector<4x8x8xf32>
    %10 = tpu.matmul %5, %7, %cst_3 {dimension_numbers = #tpu.dot_dimension_numbers<[2], [2], [1], [1], [0, 0, 0, 1, 1, 1], [0], [0]>} : vector<4x8x32xbf16>, vector<4x8x32xbf16>, vector<4x8x8xf32> -> vector<4x8x8xf32>
    "tpu.trace_stop"() : () -> ()
    %cst_4 = arith.constant dense<0xFF800000> : vector<4x8xf32>
    %11 = vector.multi_reduction <maximumf>, %10, %cst_4 [2] : vector<4x8x8xf32> to vector<4x8xf32>
    %12 = vector.shape_cast %11 : vector<4x8xf32> to vector<4x8x1xf32>
    %13 = vector.broadcast %12 : vector<4x8x1xf32> to vector<4x8x8xf32>
    %14 = arith.subf %10, %13 : vector<4x8x8xf32>
    %15 = math.exp %14 : vector<4x8x8xf32>
    %cst_5 = arith.constant dense<0.000000e+00> : vector<4x8xf32>
    %16 = vector.multi_reduction <add>, %15, %cst_5 [2] : vector<4x8x8xf32> to vector<4x8xf32>
    %17 = vector.shape_cast %16 : vector<4x8xf32> to vector<4x8x1xf32>
    %18 = tpu.reciprocal %17 {approx = true} : vector<4x8x1xf32> -> vector<4x8x1xf32>
    %19 = vector.broadcast %18 : vector<4x8x1xf32> to vector<4x8x8xf32>
    %20 = arith.mulf %15, %19 : vector<4x8x8xf32>
    %21 = arith.truncf %20 : vector<4x8x8xf32> to vector<4x8x8xbf16>
    "tpu.trace_start"() <{level = 10 : i32, message = "bqk,bkd->bqd"}> : () -> ()
    %cst_6 = arith.constant dense<0.000000e+00> : vector<4x8x32xf32>
    %22 = tpu.matmul %21, %9, %cst_6 {dimension_numbers = #tpu.dot_dimension_numbers<[2], [1], [1], [2], [0, 0, 0, 1, 1, 2], [0], [0]>} : vector<4x8x8xbf16>, vector<4x8x32xbf16>, vector<4x8x32xf32> -> vector<4x8x32xf32>
    "tpu.trace_stop"() : () -> ()
    %23 = vector.extract_strided_slice %3 {offsets = [0, 0, 32], sizes = [4, 8, 32], strides = [1, 1, 1]} : vector<4x8x384xf32> to vector<4x8x32xf32>
    %24 = arith.truncf %23 : vector<4x8x32xf32> to vector<4x8x32xbf16>
    %25 = vector.extract_strided_slice %3 {offsets = [0, 0, 160], sizes = [4, 8, 32], strides = [1, 1, 1]} : vector<4x8x384xf32> to vector<4x8x32xf32>
    %26 = arith.truncf %25 : vector<4x8x32xf32> to vector<4x8x32xbf16>
    %27 = vector.extract_strided_slice %3 {offsets = [0, 0, 288], sizes = [4, 8, 32], strides = [1, 1, 1]} : vector<4x8x384xf32> to vector<4x8x32xf32>
    %28 = arith.truncf %27 : vector<4x8x32xf32> to vector<4x8x32xbf16>
    "tpu.trace_start"() <{level = 10 : i32, message = "bqd,bkd->bqk"}> : () -> ()
    %cst_7 = arith.constant dense<0.000000e+00> : vector<4x8x8xf32>
    %29 = tpu.matmul %24, %26, %cst_7 {dimension_numbers = #tpu.dot_dimension_numbers<[2], [2], [1], [1], [0, 0, 0, 1, 1, 1], [0], [0]>} : vector<4x8x32xbf16>, vector<4x8x32xbf16>, vector<4x8x8xf32> -> vector<4x8x8xf32>
    "tpu.trace_stop"() : () -> ()
    %cst_8 = arith.constant dense<0xFF800000> : vector<4x8xf32>
    %30 = vector.multi_reduction <maximumf>, %29, %cst_8 [2] : vector<4x8x8xf32> to vector<4x8xf32>
    %31 = vector.shape_cast %30 : vector<4x8xf32> to vector<4x8x1xf32>
    %32 = vector.broadcast %31 : vector<4x8x1xf32> to vector<4x8x8xf32>
    %33 = arith.subf %29, %32 : vector<4x8x8xf32>
    %34 = math.exp %33 : vector<4x8x8xf32>
    %cst_9 = arith.constant dense<0.000000e+00> : vector<4x8xf32>
    %35 = vector.multi_reduction <add>, %34, %cst_9 [2] : vector<4x8x8xf32> to vector<4x8xf32>
    %36 = vector.shape_cast %35 : vector<4x8xf32> to vector<4x8x1xf32>
    %37 = tpu.reciprocal %36 {approx = true} : vector<4x8x1xf32> -> vector<4x8x1xf32>
    %38 = vector.broadcast %37 : vector<4x8x1xf32> to vector<4x8x8xf32>
    %39 = arith.mulf %34, %38 : vector<4x8x8xf32>
    %40 = arith.truncf %39 : vector<4x8x8xf32> to vector<4x8x8xbf16>
    "tpu.trace_start"() <{level = 10 : i32, message = "bqk,bkd->bqd"}> : () -> ()
    %cst_10 = arith.constant dense<0.000000e+00> : vector<4x8x32xf32>
    %41 = tpu.matmul %40, %28, %cst_10 {dimension_numbers = #tpu.dot_dimension_numbers<[2], [1], [1], [2], [0, 0, 0, 1, 1, 2], [0], [0]>} : vector<4x8x8xbf16>, vector<4x8x32xbf16>, vector<4x8x32xf32> -> vector<4x8x32xf32>
    "tpu.trace_stop"() : () -> ()
    %42 = vector.extract_strided_slice %3 {offsets = [0, 0, 64], sizes = [4, 8, 32], strides = [1, 1, 1]} : vector<4x8x384xf32> to vector<4x8x32xf32>
    %43 = arith.truncf %42 : vector<4x8x32xf32> to vector<4x8x32xbf16>
    %44 = vector.extract_strided_slice %3 {offsets = [0, 0, 192], sizes = [4, 8, 32], strides = [1, 1, 1]} : vector<4x8x384xf32> to vector<4x8x32xf32>
    %45 = arith.truncf %44 : vector<4x8x32xf32> to vector<4x8x32xbf16>
    %46 = vector.extract_strided_slice %3 {offsets = [0, 0, 320], sizes = [4, 8, 32], strides = [1, 1, 1]} : vector<4x8x384xf32> to vector<4x8x32xf32>
    %47 = arith.truncf %46 : vector<4x8x32xf32> to vector<4x8x32xbf16>
    "tpu.trace_start"() <{level = 10 : i32, message = "bqd,bkd->bqk"}> : () -> ()
    %cst_11 = arith.constant dense<0.000000e+00> : vector<4x8x8xf32>
    %48 = tpu.matmul %43, %45, %cst_11 {dimension_numbers = #tpu.dot_dimension_numbers<[2], [2], [1], [1], [0, 0, 0, 1, 1, 1], [0], [0]>} : vector<4x8x32xbf16>, vector<4x8x32xbf16>, vector<4x8x8xf32> -> vector<4x8x8xf32>
    "tpu.trace_stop"() : () -> ()
    %cst_12 = arith.constant dense<0xFF800000> : vector<4x8xf32>
    %49 = vector.multi_reduction <maximumf>, %48, %cst_12 [2] : vector<4x8x8xf32> to vector<4x8xf32>
    %50 = vector.shape_cast %49 : vector<4x8xf32> to vector<4x8x1xf32>
    %51 = vector.broadcast %50 : vector<4x8x1xf32> to vector<4x8x8xf32>
    %52 = arith.subf %48, %51 : vector<4x8x8xf32>
    %53 = math.exp %52 : vector<4x8x8xf32>
    %cst_13 = arith.constant dense<0.000000e+00> : vector<4x8xf32>
    %54 = vector.multi_reduction <add>, %53, %cst_13 [2] : vector<4x8x8xf32> to vector<4x8xf32>
    %55 = vector.shape_cast %54 : vector<4x8xf32> to vector<4x8x1xf32>
    %56 = tpu.reciprocal %55 {approx = true} : vector<4x8x1xf32> -> vector<4x8x1xf32>
    %57 = vector.broadcast %56 : vector<4x8x1xf32> to vector<4x8x8xf32>
    %58 = arith.mulf %53, %57 : vector<4x8x8xf32>
    %59 = arith.truncf %58 : vector<4x8x8xf32> to vector<4x8x8xbf16>
    "tpu.trace_start"() <{level = 10 : i32, message = "bqk,bkd->bqd"}> : () -> ()
    %cst_14 = arith.constant dense<0.000000e+00> : vector<4x8x32xf32>
    %60 = tpu.matmul %59, %47, %cst_14 {dimension_numbers = #tpu.dot_dimension_numbers<[2], [1], [1], [2], [0, 0, 0, 1, 1, 2], [0], [0]>} : vector<4x8x8xbf16>, vector<4x8x32xbf16>, vector<4x8x32xf32> -> vector<4x8x32xf32>
    "tpu.trace_stop"() : () -> ()
    %61 = vector.extract_strided_slice %3 {offsets = [0, 0, 96], sizes = [4, 8, 32], strides = [1, 1, 1]} : vector<4x8x384xf32> to vector<4x8x32xf32>
    %62 = arith.truncf %61 : vector<4x8x32xf32> to vector<4x8x32xbf16>
    %63 = vector.extract_strided_slice %3 {offsets = [0, 0, 224], sizes = [4, 8, 32], strides = [1, 1, 1]} : vector<4x8x384xf32> to vector<4x8x32xf32>
    %64 = arith.truncf %63 : vector<4x8x32xf32> to vector<4x8x32xbf16>
    %65 = vector.extract_strided_slice %3 {offsets = [0, 0, 352], sizes = [4, 8, 32], strides = [1, 1, 1]} : vector<4x8x384xf32> to vector<4x8x32xf32>
    %66 = arith.truncf %65 : vector<4x8x32xf32> to vector<4x8x32xbf16>
    "tpu.trace_start"() <{level = 10 : i32, message = "bqd,bkd->bqk"}> : () -> ()
    %cst_15 = arith.constant dense<0.000000e+00> : vector<4x8x8xf32>
    %67 = tpu.matmul %62, %64, %cst_15 {dimension_numbers = #tpu.dot_dimension_numbers<[2], [2], [1], [1], [0, 0, 0, 1, 1, 1], [0], [0]>} : vector<4x8x32xbf16>, vector<4x8x32xbf16>, vector<4x8x8xf32> -> vector<4x8x8xf32>
    "tpu.trace_stop"() : () -> ()
    %cst_16 = arith.constant dense<0xFF800000> : vector<4x8xf32>
    %68 = vector.multi_reduction <maximumf>, %67, %cst_16 [2] : vector<4x8x8xf32> to vector<4x8xf32>
    %69 = vector.shape_cast %68 : vector<4x8xf32> to vector<4x8x1xf32>
    %70 = vector.broadcast %69 : vector<4x8x1xf32> to vector<4x8x8xf32>
    %71 = arith.subf %67, %70 : vector<4x8x8xf32>
    %72 = math.exp %71 : vector<4x8x8xf32>
    %cst_17 = arith.constant dense<0.000000e+00> : vector<4x8xf32>
    %73 = vector.multi_reduction <add>, %72, %cst_17 [2] : vector<4x8x8xf32> to vector<4x8xf32>
    %74 = vector.shape_cast %73 : vector<4x8xf32> to vector<4x8x1xf32>
    %75 = tpu.reciprocal %74 {approx = true} : vector<4x8x1xf32> -> vector<4x8x1xf32>
    %76 = vector.broadcast %75 : vector<4x8x1xf32> to vector<4x8x8xf32>
    %77 = arith.mulf %72, %76 : vector<4x8x8xf32>
    %78 = arith.truncf %77 : vector<4x8x8xf32> to vector<4x8x8xbf16>
    "tpu.trace_start"() <{level = 10 : i32, message = "bqk,bkd->bqd"}> : () -> ()
    %cst_18 = arith.constant dense<0.000000e+00> : vector<4x8x32xf32>
    %79 = tpu.matmul %78, %66, %cst_18 {dimension_numbers = #tpu.dot_dimension_numbers<[2], [1], [1], [2], [0, 0, 0, 1, 1, 2], [0], [0]>} : vector<4x8x8xbf16>, vector<4x8x32xbf16>, vector<4x8x32xf32> -> vector<4x8x32xf32>
    "tpu.trace_stop"() : () -> ()
    %80 = tpu.concatenate %22, %41, %60, %79 in 2 : vector<4x8x32xf32>, vector<4x8x32xf32>, vector<4x8x32xf32>, vector<4x8x32xf32> -> vector<4x8x128xf32>
    %81 = vector.shape_cast %80 : vector<4x8x128xf32> to vector<32x128xf32>
    %82 = arith.truncf %81 : vector<32x128xf32> to vector<32x128xbf16>
    %c0_19 = arith.constant 0 : index
    %c0_20 = arith.constant 0 : index
    %83 = vector.load %arg3[%c0_19, %c0_20] : memref<128x128xbf16, #tpu.memory_space<vmem>>, vector<128x128xbf16>
    %cst_21 = arith.constant dense<0.000000e+00> : vector<32x128xf32>
    %84 = tpu.matmul %82, %83, %cst_21 {dimension_numbers = #tpu.dot_dimension_numbers<[1], [0], [0], [1], [0, 0, 1, 1], [], []>} : vector<32x128xbf16>, vector<128x128xbf16>, vector<32x128xf32> -> vector<32x128xf32>
    %c0_22 = arith.constant 0 : index
    %c0_23 = arith.constant 0 : index
    %85 = vector.load %arg4[%c0_22, %c0_23] : memref<1x128xf32, #tpu.memory_space<vmem>>, vector<1x128xf32>
    %86 = vector.broadcast %85 : vector<1x128xf32> to vector<32x128xf32>
    %87 = arith.addf %84, %86 : vector<32x128xf32>
    %c0_24 = arith.constant 0 : index
    %c0_25 = arith.constant 0 : index
    %88 = vector.load %arg5[%c0_24, %c0_25] : memref<32x128xf32, #tpu.memory_space<vmem>>, vector<32x128xf32>
    tpu.vector_store %arg5[%c0_24, %c0_25], %87 {strides = array<i32>} : memref<32x128xf32, #tpu.memory_space<vmem>>, vector<32x128xf32>,
    return
  }
  func.func @transform_0(%arg0: i32) -> (i32, i32) {
    %c0_i32 = arith.constant 0 : i32
    %c0_i32_0 = arith.constant 0 : i32
    return %arg0, %c0_i32 : i32, i32
  }
  func.func @transform_1(%arg0: i32) -> (i32, i32) {
    %c0_i32 = arith.constant 0 : i32
    %c0_i32_0 = arith.constant 0 : i32
    %c0_i32_1 = arith.constant 0 : i32
    return %c0_i32, %c0_i32_0 : i32, i32
  }
  func.func @transform_2(%arg0: i32) -> (i32, i32) {
    %c0_i32 = arith.constant 0 : i32
    %c0_i32_0 = arith.constant 0 : i32
    %c0_i32_1 = arith.constant 0 : i32
    return %c0_i32, %c0_i32_0 : i32, i32
  }
  func.func @transform_3(%arg0: i32) -> (i32, i32) {
    %c0_i32 = arith.constant 0 : i32
    %c0_i32_0 = arith.constant 0 : i32
    %c0_i32_1 = arith.constant 0 : i32
    return %c0_i32, %c0_i32_0 : i32, i32
  }
  func.func @transform_4(%arg0: i32) -> (i32, i32) {
    %c0_i32 = arith.constant 0 : i32
    %c0_i32_0 = arith.constant 0 : i32
    return %arg0, %c0_i32 : i32, i32
  }
}

</mosaic_0001>

<bundles_post_ra>
// kernel: tpu_custom_call.1
= control target key start
LH: loop header
LB: loop body
LE: loop exit
PB: predicated region body
PF: predicated region fallthrough
CT: control target
= control target key end

     0   :  { %9 = vsyncpa [#allocation3], 0  ;;  %s4007_s0 = inlined_call_operand.hbm [shape: bf16[64,128], index: 0, kind: input, shape index: {}]   ;;  %s4008_s1 = inlined_call_operand.hbm [shape: bf16[128,384], index: 1, kind: input, shape index: {}]   ;;  %s4009_s2 = inlined_call_operand.hbm [shape: bf16[128,128], index: 2, kind: input, shape index: {}]   ;;  %s4010_s3 = inlined_call_operand.vmem [shape: f32[1,128], index: 3, kind: input, shape index: {}]   ;;  %s4011_s4 = inlined_call_operand.hbm [shape: f32[64,128], index: 4, kind: output, shape index: {}]  }
   0x1   :  { %11 = vsyncpa [#allocation3 + $0x1], 0 }
   0x2   :  { %12 = vsyncpa [#allocation6], 0 }
   0x3   :  { %13 = vsyncpa [#allocation4], 0 }
   0x4   :  { %15 = vsyncpa [#allocation4 + $0x1], 0  ;;  %s3400_s15 = smov 0   ;;  %s3402_s16 = smov 0  }
   0x5   :  { %s3404_s17 = smov 0   ;;  %s3406_s18 = smov 0  }
   0x6 LB: > { %s3421_s19 = sadd.s32 4294967295, %s3357_s18   ;;  %s2583_s20 = sadd.s32 4294967294, %s3357_s18   ;;  %s3357_s18 = sphi %s3406_s18, %s4031_s18   ;;  %s3353_s17 = sphi %s3404_s17, %s4030_s17   ;;  %s3349_s16 = sphi %s3402_s16, %s4029_s16   ;;  %s3345_s15 = sphi %s3400_s15, %s4028_s15  }
   0x7   : > { %p41_p0 = scmp.ne.s32.totalorder %s3349_s16, %s3345_s15  ;;  %p4012_p1 = scmp.eq.s32.totalorder %s3421_s19, 0 }
   0x8   : > { %p134_p3 = scmp.eq.s32.totalorder %s2583_s20, 1  ;;  %p2584_p5 = scmp.ge.s32.totalorder %s3357_s18, 1 }
   0x9   : > { %p3430_p4 = por %p4012_p1, %p41_p0  ;;  %p141_p7 = scmp.lt.s32.totalorder %s3357_s18, 3 }
   0xa   : > { %p3435_p6 = por %p134_p3, %p41_p0  ;;  %s3359_s24 = smov [#allocation5]  }
   0xb   : > { %s4015_s21 = scalar_select %p3430_p4, 1, 0 }
   0xc   : > { %s4016_s22 = scalar_select %p3435_p6, 1, 0 }
   0xd   : > { %p3440_p8 = pnand %p2584_p5, %p141_p7  ;;  %s153_s25 = sshll.u32 %s3359_s24, 4  ;;  %s3444_s25 = int_to_ptr.vmem [resolvable:$true] %s153_s25 }
   0xe   : > { %s3360_s27 = smov [#allocation7]   ;;  %s3201_s5 = scalar_lea.hbm %s4008_s1, 3072 }
   0xf   : > { %p2998_p9 = pneg %p3440_p8  ;;  %s166_s28 = sshll.u32 %s3360_s27, 4  ;;  %s3455_s28 = int_to_ptr.vmem [resolvable:$true] %s166_s28 }
  0x10   : > { %p3202_p12 = scmp.ne.s32.totalorder %s4008_s1, %s3201_s5  ;;  %p3208_p5 = scmp.lt.u32.totalorder %s3201_s5, %s4008_s1 }
  0x11   : > { %p3451_p11 = pnand %p2998_p9, %p4012_p1 }
  0x13   : > { %p3203_p13 = pneg %p3451_p11 }
  0x15   : > { %p3204_p0 = pnand %p3203_p13, %p3202_p12 }
  0x17   : > { %p3205_p3 = pneg %p3204_p0 }
  0x19   : > { %p3210_p7 = pnand %p3208_p5, %p3205_p3 }
  0x1b   : > { %3213 = shalt.err (!%p3210_p7)
}
  0x1c   : > { %s3214_s10 = scalar_lea.vmem %s3444_s25, 3072  ;;  %p3222_p2 = scmp.lt.s32.totalorder %s3444_s25, %s3444_s25 }
  0x1d   : > { %p3215_p9 = scmp.ne.s32.totalorder %s3444_s25, %s3214_s10  ;;  %p3223_p12 = scmp.lt.s32.totalorder %s3214_s10, %s3214_s10 }
  0x1f   : > { %p3217_p10 = pnand %p3215_p9, %p3203_p13  ;;  %p3224_p0 = por %p3223_p12, %p3222_p2 }
  0x21   : > { %p3218_p1 = pneg %p3217_p10 }
  0x23   : > { %p3225_p6 = pnand %p3224_p0, %p3218_p1 }
  0x25   : > { %3228 = shalt.err (!%p3225_p6)
}
  0x26   : > { %s3361_s11 = smov 192   ;;  %s3362_s12 = smov 12  }
  0x27   : > { %3001 = dma.hbm_to_vmem [thread:$0]  (!%p3451_p11), %s4008_s1, 3072, %s3444_s25, [#allocation6], %s3361_s11, %s3361_s11, %s3362_s12  }
  0x28   : > { %s3229_s27 = scalar_lea.hbm %s4009_s2, 1024 }
  0x29   : > { %p3230_p2 = scmp.ne.s32.totalorder %s4009_s2, %s3229_s27  ;;  %p3236_p10 = scmp.lt.u32.totalorder %s3229_s27, %s4009_s2 }
  0x2b   : > { %p3232_p1 = pnand %p3230_p2, %p3203_p13 }
  0x2d   : > { %p3233_p6 = pneg %p3232_p1 }
  0x2f   : > { %p3238_p3 = pnand %p3236_p10, %p3233_p6 }
  0x31   : > { %3241 = shalt.err (!%p3238_p3)
}
  0x32   : > { %s3242_s25 = scalar_lea.vmem %s3455_s28, 1024  ;;  %p3250_p12 = scmp.lt.s32.totalorder %s3455_s28, %s3455_s28 }
  0x33   : > { %p3243_p5 = scmp.ne.s32.totalorder %s3455_s28, %s3242_s25  ;;  %p3251_p0 = scmp.lt.s32.totalorder %s3242_s25, %s3242_s25 }
  0x35   : > { %p3245_p7 = pnand %p3243_p5, %p3203_p13  ;;  %p3252_p2 = por %p3251_p0, %p3250_p12 }
  0x37   : > { %p3246_p9 = pneg %p3245_p7 }
  0x39   : > { %p3253_p1 = pnand %p3252_p2, %p3246_p9 }
  0x3b   : > { %3256 = shalt.err (!%p3253_p1)
}
  0x3c   : > { %s3363_s7 = smov 64   ;;  %s3364_s8 = smov 4  }
  0x3d   : > { %3004 = dma.hbm_to_vmem [thread:$0]  (!%p3451_p11), %s4009_s2, 1024, %s3455_s28, [#allocation6], %s3363_s7, %s3363_s7, %s3364_s8  }
  0x3e   : > { %s3513_s11 = sadd.s32 1, %s3357_s18   ;;  %s28_s13 = sadd.s32 1, %s3353_s17 }
  0x3f   : > { %s25_s12 = ssub.s32 %s3357_s18, %s3513_s11  ;;  %p35_p6 = scmp.ne.s32.totalorder %s3353_s17, %s3349_s16 }
  0x40   : > { %p26_p13 = scmp.eq.s32.totalorder %s25_s12, 0  ;;  %p36_p10 = scmp.eq.s32.totalorder %s3357_s18, 0 }
  0x41   : > { %p4019_p5 = scmp.eq.s32.totalorder %s3421_s19, 1  ;;  %p3015_p9 = scmp.lt.s32.totalorder %s3357_s18, 2 }
  0x42   : > { %s3522_s14 = scalar_select %p26_p13, %s3353_s17, %s28_s13  }
  0x43   : > { %p37_p3 = por %p36_p10, %p35_p6  ;;  %p3526_p7 = por %p4019_p5, %p35_p6 }
  0x44   : > { %s183_s20 = sand.u32 1, %s3353_s17   ;;  %s2668_s28 = sshll.u32 %s3357_s18, 8 }
  0x45   : > { %s4020_s26 = scalar_select %p3526_p7, 1, 0 }
  0x46   : > { %s2588_s24 = sshll.u32 %s183_s20, 4  ;;  %s3536_s30 = scalar_lea.hbm %s4007_s0, %s2668_s28 }
  0x47   : > { %s187_s5 = scalar_lea.vmem [#allocation2], %s2588_s24  ;;  %p3540_p11 = pnand %p3015_p9, %p37_p3 }
  0x48   : > { %s194_s6 = sshll.u32 %s187_s5, 4  ;;  %s3544_s9 = scalar_lea.sflag [#allocation3], %s183_s20  ;;  %s3538_s6 = int_to_ptr.vmem [resolvable:$true] %s194_s6 }
  0x49   : > { %s3257_s10 = scalar_lea.hbm %s3536_s30, 256  ;;  %p3259_p0 = pneg %p3540_p11 }
  0x4a   : > { %p3258_p12 = scmp.ne.s32.totalorder %s3536_s30, %s3257_s10  ;;  %s3262_s24 = scalar_lea.hbm %s4007_s0, 512 }
  0x4b   : > { %p3263_p13 = scmp.lt.u32.totalorder %s3536_s30, %s4007_s0  ;;  %p3264_p6 = scmp.lt.u32.totalorder %s3262_s24, %s3257_s10 }
  0x4c   : > { %p3260_p2 = pnand %p3259_p0, %p3258_p12  ;;  %p3266_p3 = scmp.lt.u32.totalorder %s3257_s10, %s3536_s30 }
  0x4d   : > { %p3265_p10 = por %p3264_p6, %p3263_p13 }
  0x4e   : > { %p3261_p1 = pneg %p3260_p2 }
  0x4f   : > { %p3267_p5 = por %p3266_p3, %p3265_p10 }
  0x51   : > { %p3268_p9 = pnand %p3267_p5, %p3261_p1 }
  0x53   : > { %3271 = shalt.err (!%p3268_p9)
}
  0x54   : > { %s3272_s20 = scalar_lea.vmem %s3538_s6, 256  ;;  %s3365_s29 = smov [#allocation2]  }
  0x55   : > { %p3273_p12 = scmp.ne.s32.totalorder %s3538_s6, %s3272_s20  ;;  %s3277_s5 = sshll.u32 %s3365_s29, 4  ;;  %s3278_s5 = int_to_ptr.vmem [resolvable:$false] %s3277_s5 }
  0x56   : > { %s3279_s12 = scalar_lea.vmem %s3278_s5, 512  ;;  %p3280_p4 = scmp.lt.s32.totalorder %s3538_s6, %s3278_s5 }
  0x57   : > { %p3275_p2 = pnand %p3273_p12, %p3259_p0  ;;  %p3281_p13 = scmp.lt.s32.totalorder %s3279_s12, %s3272_s20 }
  0x59   : > { %p3276_p7 = pneg %p3275_p2  ;;  %p3282_p6 = por %p3281_p13, %p3280_p4 }
  0x5b   : > { %p3283_p10 = pnand %p3282_p6, %p3276_p7 }
  0x5d   : > { %3286 = shalt.err (!%p3283_p10)
}
  0x5e   : > { %3008 = dma.hbm_to_vmem [thread:$0]  (!%p3540_p11), %s3536_s30, 256, %s3538_s6, %s3544_s9, %s3363_s7, %s3363_s7, %s3364_s8  }
  0x5f   : > { %206 = sbr.rel (%p3440_p8) target bundleno = 3293 (0xcdd), region = 36  ;;  %s3578_s10 = sand.u32 (!%p3440_p8), 1, %s3349_s16  }
  0x60   : > { %s2592_s13 = sshll.u32 (!%p3440_p8), %s3578_s10, 4  ;;  %s209_s24 = scalar_lea.sflag (!%p3440_p8), [#allocation3], %s3578_s10 }
  0x61   : > { %s3582_s28 = scalar_lea.vmem (!%p3440_p8), [#allocation2], %s2592_s13  ;;  %p4022_p4 = scmp.ne.s32.totalorder (!%p3440_p8), %s4015_s21, 0 }
  0x66   : > { %3332 = dma.done.wait (%p4022_p4), %s209_s24, 256  }
  0x67   : > { %3334 = vsyncadd (%p4022_p4), %s209_s24, 4294967040  ;;  %p4023_p7 = scmp.eq.s32.totalorder %s3421_s19, 0 }
  0x69   : > { %3336 = dma.done.wait (%p4023_p7), [#allocation6], 4096   ;;  %p4024_p8 = pmov %p4023_p7 }
  0x6a   : > { %v3366_v0 = vmov 0   ;;  %v3095_v1 = vld [vmem:[#allocation5 + $0x4] ss:$12 sps:$4 sm:$0xff]   ;;  %v3097_v2 = vld [vmem:[#allocation5] ss:$12 sps:$4 sm:$0xff]   ;;  %v3367_v27 = vmov 0.0  }
  0x6b   : > { %3338 = vsyncadd (%p4024_p8), [#allocation6], 4294963200  ;;  %456 = vmatprep.mubr.bf16.mxu0 %v3366_v0  ;;  %424 = vmatprep.subr.bf16.mxu0 %v3095_v1  ;;  %v3098_v3 = vld [vmem:[#allocation5 + $0x1c] ss:$12 sps:$4 sm:$0xff]   ;;  %v3100_v4 = vld [vmem:[#allocation5 + $0x18] ss:$12 sps:$4 sm:$0xff]  }
  0x6c   : > { %425 = vmatpush1.bf16.msra.mxu0 %v3097_v2  ;;  %v3101_v5 = vld [vmem:[#allocation5 + $0x34] ss:$12 sps:$4 sm:$0xff]   ;;  %v3103_v6 = vld [vmem:[#allocation5 + $0x30] ss:$12 sps:$4 sm:$0xff]   ;;  %v3104_v7 = vld [vmem:[#allocation5 + $0x4c] ss:$12 sps:$4 sm:$0xff]  }
  0x6d   : > { %426 = vmatprep.subr.bf16.mxu0 %v3098_v3  ;;  %v3106_v8 = vld [vmem:[#allocation5 + $0x48] ss:$12 sps:$4 sm:$0xff]   ;;  %v3107_v10 = vld [vmem:[#allocation5 + $0x64] ss:$12 sps:$4 sm:$0xff]   ;;  %v3122_v12 = vld [vmem:[#allocation5 + $0x20] ss:$12 sps:$4 sm:$0xff]  }
  0x6e   : > { %v3119_v9 = vld [vmem:[%s3582_s28] sm:$0xff]   ;;  %v3110_v14 = vld [vmem:[#allocation5 + $0x7c] ss:$12 sps:$4 sm:$0xff]   ;;  %v3116_v20 = vld [vmem:[#allocation5 + $0xac] ss:$12 sps:$4 sm:$0xff]   ;;  %vm3368_vm0 = vmmov 0  }
  0x6f   : > { %v3121_v11 = vld [vmem:[#allocation5 + $0x8] ss:$12 sps:$4 sm:$0xff]   ;;  %2770 = vmatprep.mubr.bf16.mxu1 %v3119_v9  ;;  %v3109_v13 = vld [vmem:[#allocation5 + $0x60] ss:$12 sps:$4 sm:$0xff]   ;;  %v3112_v15 = vld [vmem:[#allocation5 + $0x78] ss:$12 sps:$4 sm:$0xff]  }
  0x70   : > { %427 = vmatpush1.bf16.msra.mxu0 %v3100_v4  ;;  %2754 = vmatprep.subr.bf16.mxu1 %v3121_v11  ;;  %v3123_v16 = vld [vmem:[#allocation5 + $0x38] ss:$12 sps:$4 sm:$0xff]   ;;  %v3113_v17 = vld [vmem:[#allocation5 + $0x94] ss:$12 sps:$4 sm:$0xff]   ;;  %v3124_v18 = vld [vmem:[#allocation5 + $0x50] ss:$12 sps:$4 sm:$0xff]  }
  0x71   : > { %428 = vmatprep.subr.bf16.mxu0 %v3101_v5  ;;  %2755 = vmatpush3.bf16.msra.mxu1 %v3121_v11  ;;  %v3115_v19 = vld [vmem:[#allocation5 + $0x90] ss:$12 sps:$4 sm:$0xff]   ;;  %v3125_v21 = vld [vmem:[#allocation5 + $0x68] ss:$12 sps:$4 sm:$0xff]   ;;  %v3126_v23 = vld [vmem:[#allocation5 + $0x80] ss:$12 sps:$4 sm:$0xff]  }
  0x72   : > { %2756 = vmatprep.subr.bf16.mxu1 %v3122_v12  ;;  %v3118_v22 = vld [vmem:[#allocation5 + $0xa8] ss:$12 sps:$4 sm:$0xff]   ;;  %v3127_v24 = vld [vmem:[#allocation5 + $0x98] ss:$12 sps:$4 sm:$0xff]   ;;  %v3128_v26 = vld [vmem:[#allocation5 + $0xb0] ss:$12 sps:$4 sm:$0xff]  }
  0x73   : > { %v3120_v25 = vld [vmem:[%s3582_s28 + $0x8] sm:$0xff]   ;;  %vm538_vm1 = vcmask 261120   ;;  %vm775_vm2 = vcmask 1043456   ;;  %vm723_vm3 = vcmask 64512   ;;  %s3369_s21 = smov 96   ;;  %s3370_s23 = smov 64  }
  0x74   : > { %429 = vmatpush1.bf16.msra.mxu0 %v3103_v6  ;;  %s3371_s7 = smov 32   ;;  %vm2341_vm4 = vcmask 523264   ;;  %vm2346_vm5 = vcmask 785408   ;;  %s2595_s8 = sshll.u32 %s3578_s10, 5 }
  0x75   : > { %430 = vmatprep.subr.bf16.mxu0 %v3104_v7  ;;  %2757 = vmatpush3.bf16.msra.mxu1 %v3122_v12  ;;  %s244_s25 = scalar_lea.vmem [#allocation8], %s2595_s8  ;;  %s2669_s27 = sshll.u32 %s3421_s19, 9 }
  0x76   : > { %2758 = vmatprep.subr.bf16.mxu1 %v3123_v16  ;;  %s2491_s9 = sshll.u32 %s244_s25, 4  ;;  %s3963_s5 = scalar_lea.hbm %s4011_s4, %s2669_s27  ;;  %s3958_s9 = int_to_ptr.vmem [resolvable:$true] %s2491_s9 }
  0x77   : > { %s2478_s19 = scalar_lea.sflag [#allocation4], %s3578_s10  ;;  %s3287_s12 = scalar_lea.vmem %s3958_s9, 512 }
  0x78   : > { %431 = vmatpush1.bf16.msra.mxu0 %v3106_v8  ;;  %p3288_p11 = scmp.ne.s32.totalorder %s3958_s9, %s3287_s12  ;;  %p4025_p0 = scmp.ne.s32.totalorder %s4020_s26, 0 }
  0x79   : > { %432 = vmatprep.subr.bf16.mxu0 %v3107_v10  ;;  %2759 = vmatpush3.bf16.msra.mxu1 %v3123_v16  ;;  %s3372_s13 = smov [#allocation8]  }
  0x7a   : > { %2760 = vmatprep.subr.bf16.mxu1 %v3124_v18  ;;  %p3289_p1 = pnand %p3288_p11, %p4025_p0  ;;  %s3291_s24 = sshll.u32 %s3372_s13, 4  ;;  %s3292_s24 = int_to_ptr.vmem [resolvable:$false] %s3291_s24 }
  0x7b   : > { %s3293_s28 = scalar_lea.vmem %s3292_s24, 1024  ;;  %p3294_p5 = scmp.lt.s32.totalorder %s3958_s9, %s3292_s24 }
  0x7c   : > { %433 = vmatpush1.bf16.msra.mxu0 %v3109_v13  ;;  %p3290_p3 = pneg %p3289_p1  ;;  %p3295_p9 = scmp.lt.s32.totalorder %s3293_s28, %s3287_s12 }
  0x7d   : > { %434 = vmatprep.subr.bf16.mxu0 %v3110_v14  ;;  %2761 = vmatpush3.bf16.msra.mxu1 %v3124_v18 }
  0x7e   : > { %2762 = vmatprep.subr.bf16.mxu1 %v3125_v21  ;;  %p3296_p12 = por %p3295_p9, %p3294_p5 }
  0x80   : > { %435 = vmatpush1.bf16.msra.mxu0 %v3112_v15  ;;  %p3297_p2 = pnand %p3296_p12, %p3290_p3 }
  0x81   : > { %436 = vmatprep.subr.bf16.mxu0 %v3113_v17  ;;  %2763 = vmatpush3.bf16.msra.mxu1 %v3125_v21 }
  0x82   : > { %2764 = vmatprep.subr.bf16.mxu1 %v3126_v23 }
  0x84   : > { %437 = vmatpush1.bf16.msra.mxu0 %v3115_v19 }
  0x85   : > { %438 = vmatprep.subr.bf16.mxu0 %v3116_v20  ;;  %2765 = vmatpush3.bf16.msra.mxu1 %v3126_v23 }
  0x86   : > { %2766 = vmatprep.subr.bf16.mxu1 %v3127_v24 }
  0x88   : > { %439 = vmatpush1.bf16.msra.mxu0 %v3118_v22 }
  0x89   : > { %2767 = vmatpush3.bf16.msra.mxu1 %v3127_v24  ;;  %2774 = vmatprep.subr.bf16.mxu0 %v3367_v27 }
  0x8a   : > { %2768 = vmatprep.subr.bf16.mxu1 %v3128_v26 }
  0x8b   : > { %457 = vmatmul.mubr.bf16.vlgmr.msra.gmra.mrb[0].mxu0 %v3119_v9 }
  0x8c   : > { %466 = vmatprep.mubr.bf16.mxu0 %v3366_v0 }
  0x8d   : > { %2769 = vmatpush3.bf16.msra.mxu1 %v3128_v26 }
  0x8e   : > { %2786 = vmatprep.subr.bf16.mxu1 %v3367_v27 }
  0x90   : > { %2771 = vmatmul.mubr.bf16.vlgmr.msra.gmra.mrb[0].mxu1 %v3120_v25 }
  0x91   : > { %2788 = vmatprep.mubr.msk.bf16.mxu1 %vm3368_vm0, %v3367_v27 }
  0x93   : > { %467 = vmatmul.mubr.bf16.gmra.mrb[4].mxu0 %v3120_v25 }
  0x94   : > { %2776 = vmatprep.mubr.msk.bf16.mxu0 %vm3368_vm0, %v3367_v27 }
 0x15e   : > { %v458_v28 = vpop.f32.mrb[0].mxu0 }
 0x15f   : > { %v460_v29 = vpop.f32.mrb[1].mxu0  ;;  %v3607_v37 = vpack.c.bf16 %v458_v28, %v458_v28 }
 0x160   : > { %v3600_v30 = vpack.c.bf16 %v460_v29, %v460_v29  ;;  %v462_v31 = vpop.f32.mrb[2].mxu0 }
 0x161   : > { %v464_v32 = vpop.f32.mrb[3].mxu0  ;;  %v3625_v45 = vpack.c.bf16 %v462_v31, %v462_v31 }
 0x162   : > { %v543_v33 = vsel %vm538_vm1, %v3600_v30, 0  ;;  %v3605_v34 = vpack.c.bf16 %v464_v32, %v464_v32 }
 0x163   : > { %2775 = vmatpush3.bf16.xpose.msra.mxu0 %v543_v33  ;;  %v3644_v48 = vpop.f32.mrb[0].mxu1 }
 0x164   : > { %2780 = vmatprep.subr.bf16.mxu0 %v3367_v27  ;;  %v589_v41 = vsel %vm538_vm1, %v3605_v34, 0  ;;  %v511_v49 = vpop.f32.mrb[1].mxu1 }
 0x165   : > { %v3646_v50 = vpop.f32.mrb[2].mxu1  ;;  %v3648_v52 = vpack.c.bf16 %v511_v49, %v511_v49 }
 0x166   : > { %v468_v35 = vpop.f32.mrb[4].mxu0  ;;  %v514_v51 = vpop.f32.mrb[3].mxu1 }
 0x167   : > { %v470_v36 = vpop.f32.mrb[5].mxu0  ;;  %v3623_v44 = vpack.c.bf16 %v468_v35, %v468_v35  ;;  %v3650_v53 = vpack.c.bf16 %v514_v51, %v514_v51  ;;  %v777_v54 = vsel %vm775_vm2, %v3648_v52, 0 }
 0x168   : > { %v3609_v38 = vpack.c.bf16 %v470_v36, %v470_v36  ;;  %v472_v39 = vpop.f32.mrb[6].mxu0 }
 0x169   : > { %v474_v40 = vpop.f32.mrb[7].mxu0  ;;  %v3638_v47 = vpack.c.bf16 %v472_v39, %v472_v39  ;;  %v823_v55 = vsel %vm775_vm2, %v3650_v53, 0 }
 0x16a   : > { %2777 = vmatmul.mubr.msk.bf16.vlgmr.msra.gmra.mrb[8].mxu0 %vm538_vm1, %v3607_v37  ;;  %v635_v42 = vsel %vm538_vm1, %v3609_v38, 0  ;;  %v3617_v43 = vpack.c.bf16 %v474_v40, %v474_v40 }
 0x16b   : > { %2781 = vmatpush3.bf16.xpose.msra.mxu0 %v589_v41  ;;  %2787 = vmatpush3.bf16.xpose.msra.mxu1 %v635_v42  ;;  %v3684_v41 = vpack.c.bf16 %v3644_v48, %v3644_v48  ;;  %v3694_v48 = vpack.c.bf16 %v3646_v50, %v3646_v50 }
 0x16c   : > { %2782 = vmatprep.mubr.msk.bf16.mxu0 %vm3368_vm0, %v3367_v27  ;;  %2792 = vmatprep.subr.bf16.mxu0 %v3367_v27  ;;  %v681_v46 = vsel %vm538_vm1, %v3617_v43, 0 }
 0x16d   : > { %2798 = vmatprep.subr.bf16.mxu1 %v3367_v27  ;;  %v869_v49 = vsel %vm775_vm2, %v3684_v41, 0 }
 0x172   : > { %2783 = vmatmul.mubr.msk.bf16.vlgmr.msra.gmra.mrb[12].mxu0 %vm538_vm1, %v3625_v45  ;;  %2789 = vmatmul.mubr.msk.bf16.vlgmr.msra.gmra.mrb[4].mxu1 %vm538_vm1, %v3623_v44 }
 0x173   : > { %2793 = vmatpush3.bf16.xpose.msra.mxu0 %v681_v46  ;;  %2794 = vmatprep.mubr.msk.bf16.mxu0 %vm3368_vm0, %v3367_v27 }
 0x174   : > { %2804 = vmatprep.subr.bf16.mxu0 %v3367_v27  ;;  %2800 = vmatprep.mubr.msk.bf16.mxu1 %vm3368_vm0, %v3367_v27 }
 0x175   : > { %2799 = vmatpush3.bf16.msra.mxu1 %v777_v54 }
 0x176   : > { %2810 = vmatprep.subr.bf16.mxu1 %v3367_v27 }
 0x17a   : > { %2795 = vmatmul.mubr.msk.bf16.vlgmr.msra.gmra.mrb[16].mxu0 %vm538_vm1, %v3638_v47 }
 0x17b   : > { %2806 = vmatprep.mubr.msk.bf16.mxu0 %vm3368_vm0, %v3367_v27  ;;  %2805 = vmatpush3.bf16.msra.mxu0 %v823_v55 }
 0x17c   : > { %2816 = vmatprep.subr.bf16.mxu0 %v3367_v27 }
 0x23d   : > { %v579_v56 = vpop.f32.mrb[8].mxu0 }
 0x23e   : > { %v2778_v57 = vpop.f32.mrb[9].mxu0  ;;  %v724_v58 = vsel %vm723_vm3, %v579_v56, -inf }
 0x23f   : > { %725 = vmax.xlane.f32.xlu0 %v724_v58  ;;  %v582_v59 = vpop.f32.mrb[10].mxu0 }
 0x240   : > { %v2779_v60 = vpop.f32.mrb[11].mxu0 }
 0x245   : > { %v625_v61 = vpop.f32.mrb[12].mxu0  ;;  %v671_v62 = vpop.f32.mrb[4].mxu1 }
 0x246   : > { %v2784_v63 = vpop.f32.mrb[13].mxu0  ;;  %v730_v0 = vsel %vm723_vm3, %v671_v62, -inf  ;;  %v727_v1 = vsel %vm723_vm3, %v625_v61, -inf  ;;  %v2790_v2 = vpop.f32.mrb[5].mxu1 }
 0x247   : > { %731 = vmax.xlane.f32.xlu1 %v730_v0  ;;  %728 = vmax.xlane.f32.xlu0 %v727_v1  ;;  %v628_v3 = vpop.f32.mrb[14].mxu0  ;;  %v674_v4 = vpop.f32.mrb[6].mxu1 }
 0x248   : > { %v2785_v5 = vpop.f32.mrb[15].mxu0  ;;  %v2791_v6 = vpop.f32.mrb[7].mxu1 }
 0x24d   : > { %v717_v7 = vpop.f32.mrb[16].mxu0 }
 0x24e   : > { %v733_v8 = vsel %vm723_vm3, %v717_v7, -inf  ;;  %v2796_v9 = vpop.f32.mrb[17].mxu0 }
 0x24f   : > { %734 = vmax.xlane.f32.xlu1 %v733_v8  ;;  %v720_v10 = vpop.f32.mrb[18].mxu0 }
 0x250   : > { %v2797_v11 = vpop.f32.mrb[19].mxu0 }
 0x2cc   : > { %v726_v12 = vpop.xlane.xlu0 %725 }
 0x2cd   : > { %v736_v13 = vsub.f32 %v579_v56, %v726_v12 }
 0x2cf   : > { %v740_v14 = vmul.f32 1.442695, %v736_v13 }
 0x2d1   : > { %3137 = vpow2.f32 %v740_v14 }
 0x2d4   : > { %v732_v15 = vpop.xlane.xlu1 %731  ;;  %v729_v16 = vpop.xlane.xlu0 %728 }
 0x2d5   : > { %v738_v17 = vsub.f32 %v671_v62, %v732_v15  ;;  %v737_v18 = vsub.f32 %v625_v61, %v729_v16  ;;  %v915_v61 = vsel %vm775_vm2, %v3694_v48, 0 }
 0x2d7   : > { %v744_v19 = vmul.f32 1.442695, %v738_v17  ;;  %v742_v20 = vmul.f32 1.442695, %v737_v18 }
 0x2d9   : > { %3139 = vpow2.f32 %v744_v19 }
 0x2da   : > { %3141 = vpow2.f32 %v742_v20 }
 0x2db   : > { %v3138_v21 = vpop.eup %3137 }
 0x2dc   : > { %v748_v22 = vsel %vm723_vm3, %v3138_v21, 0.0  ;;  %v735_v28 = vpop.xlane.xlu1 %734 }
 0x2dd   : > { %749 = vadd.xlane.f32.xlu0 %v748_v22  ;;  %v739_v29 = vsub.f32 %v717_v7, %v735_v28 }
 0x2df   : > { %v746_v31 = vmul.f32 1.442695, %v739_v29 }
 0x2e1   : > { %3143 = vpow2.f32 %v746_v31 }
 0x2e3   : > { %v3140_v23 = vpop.eup %3139 }
 0x2e4   : > { %v3142_v24 = vpop.eup %3141  ;;  %v754_v25 = vsel %vm723_vm3, %v3140_v23, 0.0 }
 0x2e5   : > { %755 = vadd.xlane.f32.xlu0 %v754_v25  ;;  %v751_v26 = vsel %vm723_vm3, %v3142_v24, 0.0 }
 0x2e6   : > { %752 = vadd.xlane.f32.xlu1 %v751_v26 }
 0x2eb   : > { %v3144_v32 = vpop.eup %3143 }
 0x2ec   : > { %v757_v33 = vsel %vm723_vm3, %v3144_v32, 0.0 }
 0x2f7   : > { %1013 = vrot.lane.b32.xlu1 %v3605_v34, %s3369_s21 }
 0x2fb   : > { %958 = vrot.lane.b32.xlu1 %v3607_v37, %s3369_s21  ;;  %961 = vrot.lane.b32.xlu0 %v3600_v30, %s3369_s21 }
 0x2ff   : > { %1065 = vrot.lane.b32.xlu0 %v3609_v38, %s3369_s21 }
 0x303   : > { %1062 = vrot.lane.b32.xlu0 %v3623_v44, %s3369_s21 }
 0x31f   : > { %758 = vadd.xlane.f32.xlu1 %v757_v33 }
 0x330   : > { %1010 = vrot.lane.b32.xlu1 %v3625_v45, %s3369_s21 }
 0x334   : > { %1117 = vrot.lane.b32.xlu1 %v3617_v43, %s3369_s21 }
 0x338   : > { %1114 = vrot.lane.b32.xlu1 %v3638_v47, %s3369_s21 }
 0x36a   : > { %v750_v35 = vpop.xlane.xlu0 %749 }
 0x36b   : > { %3145 = vrcp.f32 %v750_v35 }
 0x372   : > { %v756_v36 = vpop.xlane.xlu0 %755 }
 0x373   : > { %3147 = vrcp.f32 %v756_v36  ;;  %v753_v39 = vpop.xlane.xlu1 %752 }
 0x374   : > { %3149 = vrcp.f32 %v753_v39 }
 0x375   : > { %v3146_v40 = vpop.eup %3145 }
 0x376   : > { %v764_v42 = vmul.f32 %v3146_v40, %v3138_v21  ;;  %v962_v57 = vpop.permute.xlu0 %961 }
 0x377   : > { %v967_v60 = vsel %vm538_vm1, %v962_v57, 0  ;;  %v1014_v62 = vpop.permute.xlu1 %1013 }
 0x378   : > { %v768_v46 = vpack.c.bf16 %v764_v42, %v764_v42  ;;  %v1019_v7 = vsel %vm538_vm1, %v1014_v62, 0 }
 0x37a   : > { %2801 = vmatmul.mubr.msk.bf16.vlgmr.msra.gmra.mrb[8].mxu1 %vm723_vm3, %v768_v46  ;;  %v1066_v50 = vpop.permute.xlu0 %1065 }
 0x37b   : > { %2811 = vmatpush3.bf16.msra.mxu1 %v869_v49  ;;  %2812 = vmatprep.mubr.msk.bf16.mxu1 %vm3368_vm0, %v3367_v27  ;;  %v959_v63 = vpop.permute.xlu1 %958  ;;  %v1071_v0 = vsel %vm538_vm1, %v1066_v50, 0 }
 0x37c   : > { %2822 = vmatprep.subr.bf16.mxu1 %v3367_v27 }
 0x37d   : > { %v3148_v51 = vpop.eup %3147 }
 0x37e   : > { %v3150_v54 = vpop.eup %3149  ;;  %v766_v55 = vmul.f32 %v3148_v51, %v3140_v23  ;;  %v1063_v1 = vpop.permute.xlu0 %1062 }
 0x37f   : > { %v765_v56 = vmul.f32 %v3150_v54, %v3142_v24 }
 0x380   : > { %v770_v58 = vpack.c.bf16 %v766_v55, %v766_v55 }
 0x381   : > { %v769_v59 = vpack.c.bf16 %v765_v56, %v765_v56 }
 0x382   : > { %2813 = vmatmul.mubr.msk.bf16.vlgmr.msra.gmra.mrb[12].mxu1 %vm723_vm3, %v770_v58 }
 0x383   : > { %2807 = vmatmul.mubr.msk.bf16.vlgmr.msra.gmra.mrb[20].mxu0 %vm723_vm3, %v769_v59  ;;  %2824 = vmatprep.mubr.msk.bf16.mxu1 %vm3368_vm0, %v3367_v27 }
 0x384   : > { %2817 = vmatpush3.bf16.msra.mxu0 %v915_v61  ;;  %2823 = vmatpush3.bf16.xpose.msra.mxu1 %v967_v60 }
 0x385   : > { %2834 = vmatprep.subr.bf16.mxu1 %v3367_v27  ;;  %2818 = vmatprep.mubr.msk.bf16.mxu0 %vm3368_vm0, %v3367_v27 }
 0x386   : > { %2828 = vmatprep.subr.bf16.mxu0 %v3367_v27 }
 0x38b   : > { %2825 = vmatmul.mubr.msk.bf16.vlgmr.msra.gmra.mrb[16].mxu1 %vm538_vm1, %v959_v63 }
 0x38c   : > { %2835 = vmatpush3.bf16.xpose.msra.mxu1 %v1071_v0  ;;  %2836 = vmatprep.mubr.msk.bf16.mxu1 %vm3368_vm0, %v3367_v27 }
 0x38d   : > { %2846 = vmatprep.subr.bf16.mxu1 %v3367_v27 }
 0x393   : > { %2837 = vmatmul.mubr.msk.bf16.vlgmr.msra.gmra.mrb[20].mxu1 %vm538_vm1, %v1063_v1 }
 0x394   : > { %2848 = vmatprep.mubr.msk.bf16.mxu1 %vm3368_vm0, %v3367_v27 }
 0x3ac   : > { %v759_v2 = vpop.xlane.xlu1 %758 }
 0x3ad   : > { %3151 = vrcp.f32 %v759_v2 }
 0x3b0   : > { %v1011_v6 = vpop.permute.xlu1 %1010 }
 0x3b4   : > { %v1118_v8 = vpop.permute.xlu1 %1117 }
 0x3b5   : > { %v1123_v9 = vsel %vm538_vm1, %v1118_v8, 0 }
 0x3b7   : > { %v3152_v3 = vpop.eup %3151 }
 0x3b8   : > { %v767_v4 = vmul.f32 %v3152_v3, %v3144_v32  ;;  %v1115_v10 = vpop.permute.xlu1 %1114 }
 0x3ba   : > { %v771_v5 = vpack.c.bf16 %v767_v4, %v767_v4 }
 0x3bc   : > { %2819 = vmatmul.mubr.msk.bf16.vlgmr.msra.gmra.mrb[24].mxu0 %vm723_vm3, %v771_v5 }
 0x3bd   : > { %2829 = vmatpush3.bf16.xpose.msra.mxu0 %v1019_v7  ;;  %2830 = vmatprep.mubr.msk.bf16.mxu0 %vm3368_vm0, %v3367_v27 }
 0x3be   : > { %2840 = vmatprep.subr.bf16.mxu0 %v3367_v27 }
 0x3c4   : > { %2831 = vmatmul.mubr.msk.bf16.vlgmr.msra.gmra.mrb[28].mxu0 %vm538_vm1, %v1011_v6 }
 0x3c5   : > { %2841 = vmatpush3.bf16.xpose.msra.mxu0 %v1123_v9  ;;  %2842 = vmatprep.mubr.msk.bf16.mxu0 %vm3368_vm0, %v3367_v27 }
 0x3c6   : > { %2852 = vmatprep.subr.bf16.mxu0 %v3367_v27 }
 0x3cc   : > { %2843 = vmatmul.mubr.msk.bf16.vlgmr.msra.gmra.mrb[32].mxu0 %vm538_vm1, %v1115_v10 }
 0x3cd   : > { %2854 = vmatprep.mubr.msk.bf16.mxu0 %vm3368_vm0, %v3367_v27 }
 0x44d   : > { %v3728_v11 = vpop.f32.mrb[8].mxu1 }
 0x44e   : > { %v2802_v12 = vpop.f32.mrb[9].mxu1 }
 0x44f   : > { %v816_v13 = vpop.f32.mrb[10].mxu1 }
 0x450   : > { %v2803_v14 = vpop.f32.mrb[11].mxu1 }
 0x455   : > { %v3730_v15 = vpop.f32.mrb[12].mxu1 }
 0x456   : > { %v3732_v16 = vpop.f32.mrb[20].mxu0  ;;  %v2814_v17 = vpop.f32.mrb[13].mxu1 }
 0x457   : > { %v2808_v18 = vpop.f32.mrb[21].mxu0  ;;  %v908_v19 = vpop.f32.mrb[14].mxu1 }
 0x458   : > { %v862_v20 = vpop.f32.mrb[22].mxu0  ;;  %v2815_v21 = vpop.f32.mrb[15].mxu1 }
 0x459   : > { %v2809_v22 = vpop.f32.mrb[23].mxu0 }
 0x45e   : > { %v1003_v23 = vpop.f32.mrb[16].mxu1 }
 0x45f   : > { %v2826_v24 = vpop.f32.mrb[17].mxu1  ;;  %v1165_v25 = vsel %vm723_vm3, %v1003_v23, -inf }
 0x460   : > { %1166 = vmax.xlane.f32.xlu0 %v1165_v25  ;;  %v1006_v26 = vpop.f32.mrb[18].mxu1 }
 0x461   : > { %v2827_v28 = vpop.f32.mrb[19].mxu1 }
 0x466   : > { %v1107_v29 = vpop.f32.mrb[20].mxu1 }
 0x467   : > { %v2838_v31 = vpop.f32.mrb[21].mxu1  ;;  %v1171_v32 = vsel %vm723_vm3, %v1107_v29, -inf }
 0x468   : > { %1172 = vmax.xlane.f32.xlu0 %v1171_v32  ;;  %v1110_v33 = vpop.f32.mrb[22].mxu1 }
 0x469   : > { %v2839_v35 = vpop.f32.mrb[23].mxu1 }
 0x48f   : > { %v3736_v36 = vpop.f32.mrb[24].mxu0 }
 0x490   : > { %v2820_v39 = vpop.f32.mrb[25].mxu0 }
 0x491   : > { %v954_v40 = vpop.f32.mrb[26].mxu0 }
 0x492   : > { %v2821_v42 = vpop.f32.mrb[27].mxu0 }
 0x497   : > { %v1055_v46 = vpop.f32.mrb[28].mxu0 }
 0x498   : > { %v2832_v49 = vpop.f32.mrb[29].mxu0  ;;  %v1168_v51 = vsel %vm723_vm3, %v1055_v46, -inf }
 0x499   : > { %1169 = vmax.xlane.f32.xlu1 %v1168_v51  ;;  %v1058_v54 = vpop.f32.mrb[30].mxu0 }
 0x49a   : > { %v2833_v55 = vpop.f32.mrb[31].mxu0 }
 0x49f   : > { %v1159_v56 = vpop.f32.mrb[32].mxu0 }
 0x4a0   : > { %v2844_v57 = vpop.f32.mrb[33].mxu0  ;;  %v1174_v58 = vsel %vm723_vm3, %v1159_v56, -inf }
 0x4a1   : > { %1175 = vmax.xlane.f32.xlu0 %v1174_v58  ;;  %v1162_v59 = vpop.f32.mrb[34].mxu0 }
 0x4a2   : > { %v2845_v60 = vpop.f32.mrb[35].mxu0 }
 0x4aa   : > { %1263 = vrot.lane.b32.xlu1 %v3650_v53, %s3369_s21 }
 0x4ae   : > { %1312 = vrot.lane.b32.xlu1 %v3684_v41, %s3369_s21 }
 0x4b2   : > { %1361 = vrot.lane.b32.xlu1 %v3694_v48, %s3369_s21 }
 0x4ed   : > { %v1167_v61 = vpop.xlane.xlu0 %1166 }
 0x4ee   : > { %v1177_v62 = vsub.f32 %v1003_v23, %v1167_v61 }
 0x4f0   : > { %v1181_v50 = vmul.f32 1.442695, %v1177_v62 }
 0x4f2   : > { %3153 = vpow2.f32 %v1181_v50 }
 0x4f5   : > { %v1173_v1 = vpop.xlane.xlu0 %1172 }
 0x4f6   : > { %v1179_v2 = vsub.f32 %v1107_v29, %v1173_v1 }
 0x4f8   : > { %v1185_v3 = vmul.f32 1.442695, %v1179_v2 }
 0x4fa   : > { %3155 = vpow2.f32 %v1185_v3 }
 0x4fc   : > { %v3154_v63 = vpop.eup %3153 }
 0x4fd   : > { %v1189_v0 = vsel %vm723_vm3, %v3154_v63, 0.0 }
 0x4fe   : > { %1190 = vadd.xlane.f32.xlu0 %v1189_v0 }
 0x504   : > { %v3156_v9 = vpop.eup %3155 }
 0x505   : > { %v1195_v10 = vsel %vm723_vm3, %v3156_v9, 0.0 }
 0x514   : > { %1214 = vrot.lane.b32.xlu0 %v3648_v52, %s3369_s21 }
 0x526   : > { %v1170_v4 = vpop.xlane.xlu1 %1169 }
 0x527   : > { %v1178_v5 = vsub.f32 %v1055_v46, %v1170_v4 }
 0x529   : > { %v1183_v6 = vmul.f32 1.442695, %v1178_v5 }
 0x52a   : > { %v1264_v7 = vpop.permute.xlu1 %1263 }
 0x52b   : > { %3157 = vpow2.f32 %v1183_v6  ;;  %v1269_v8 = vsel %vm775_vm2, %v1264_v7, 0 }
 0x52c   : > { %2853 = vmatpush3.bf16.msra.mxu0 %v1269_v8 }
 0x52d   : > { %2864 = vmatprep.subr.bf16.mxu0 %v3367_v27 }
 0x52e   : > { %v1176_v14 = vpop.xlane.xlu0 %1175  ;;  %v1313_v26 = vpop.permute.xlu1 %1312 }
 0x52f   : > { %v1180_v17 = vsub.f32 %v1159_v56, %v1176_v14  ;;  %v1318_v29 = vsel %vm775_vm2, %v1313_v26, 0 }
 0x531   : > { %v1187_v18 = vmul.f32 1.442695, %v1180_v17 }
 0x532   : > { %v1362_v31 = vpop.permute.xlu1 %1361 }
 0x533   : > { %1196 = vadd.xlane.f32.xlu0 %v1195_v10  ;;  %3159 = vpow2.f32 %v1187_v18  ;;  %v1367_v56 = vsel %vm775_vm2, %v1362_v31, 0 }
 0x535   : > { %v3158_v12 = vpop.eup %3157 }
 0x536   : > { %v1192_v13 = vsel %vm723_vm3, %v3158_v12, 0.0 }
 0x537   : > { %1193 = vadd.xlane.f32.xlu1 %v1192_v13 }
 0x53d   : > { %v3160_v19 = vpop.eup %3159 }
 0x53e   : > { %v1198_v20 = vsel %vm723_vm3, %v3160_v19, 0.0 }
 0x548   : > { %1461 = vrot.lane.b32.xlu1 %v3605_v34, %s3370_s23 }
 0x549   : > { %1411 = vrot.lane.b32.xlu0 %v3600_v30, %s3370_s23 }
 0x54d   : > { %1409 = vrot.lane.b32.xlu0 %v3607_v37, %s3370_s23 }
 0x551   : > { %1511 = vrot.lane.b32.xlu0 %v3609_v38, %s3370_s23 }
 0x555   : > { %1509 = vrot.lane.b32.xlu0 %v3623_v44, %s3370_s23 }
 0x56c   : > { %1199 = vadd.xlane.f32.xlu1 %v1198_v20 }
 0x57d   : > { %1459 = vrot.lane.b32.xlu1 %v3625_v45, %s3370_s23 }
 0x581   : > { %1561 = vrot.lane.b32.xlu1 %v3617_v43, %s3370_s23 }
 0x585   : > { %1559 = vrot.lane.b32.xlu1 %v3638_v47, %s3370_s23 }
 0x58b   : > { %v1191_v21 = vpop.xlane.xlu0 %1190 }
 0x58c   : > { %3161 = vrcp.f32 %v1191_v21 }
 0x58f   : > { %v1215_v22 = vpop.permute.xlu0 %1214 }
 0x590   : > { %v1220_v23 = vsel %vm775_vm2, %v1215_v22, 0 }
 0x591   : > { %2847 = vmatpush3.bf16.msra.mxu1 %v1220_v23 }
 0x592   : > { %2858 = vmatprep.subr.bf16.mxu1 %v3367_v27 }
 0x596   : > { %v3162_v24 = vpop.eup %3161 }
 0x597   : > { %v1205_v25 = vmul.f32 %v3162_v24, %v3154_v63 }
 0x599   : > { %v1209_v28 = vpack.c.bf16 %v1205_v25, %v1205_v25 }
 0x59b   : > { %2849 = vmatmul.mubr.msk.bf16.vlgmr.msra.gmra.mrb[24].mxu1 %vm723_vm3, %v1209_v28 }
 0x59c   : > { %2859 = vmatpush3.bf16.msra.mxu1 %v1318_v29  ;;  %2860 = vmatprep.mubr.msk.bf16.mxu1 %vm3368_vm0, %v3367_v27 }
 0x59d   : > { %2870 = vmatprep.subr.bf16.mxu1 %v3367_v27 }
 0x5c0   : > { %v1197_v32 = vpop.xlane.xlu0 %1196 }
 0x5c1   : > { %3163 = vrcp.f32 %v1197_v32 }
 0x5c4   : > { %v1194_v33 = vpop.xlane.xlu1 %1193  ;;  %v1412_v35 = vpop.permute.xlu0 %1411 }
 0x5c5   : > { %3165 = vrcp.f32 %v1194_v33  ;;  %v1417_v54 = vsel %vm538_vm1, %v1412_v35, 0 }
 0x5c8   : > { %v1410_v49 = vpop.permute.xlu0 %1409  ;;  %v1462_v60 = vpop.permute.xlu1 %1461 }
 0x5c9   : > { %v1467_v1 = vsel %vm538_vm1, %v1462_v60, 0 }
 0x5cb   : > { %v3164_v39 = vpop.eup %3163 }
 0x5cc   : > { %v1207_v40 = vmul.f32 %v3164_v39, %v3156_v9  ;;  %v1512_v57 = vpop.permute.xlu0 %1511 }
 0x5cd   : > { %v1517_v58 = vsel %vm538_vm1, %v1512_v57, 0 }
 0x5ce   : > { %v1211_v42 = vpack.c.bf16 %v1207_v40, %v1207_v40 }
 0x5cf   : > { %v3166_v46 = vpop.eup %3165 }
 0x5d0   : > { %v1206_v51 = vmul.f32 %v3166_v46, %v3158_v12  ;;  %2861 = vmatmul.mubr.msk.bf16.vlgmr.msra.gmra.mrb[28].mxu1 %vm723_vm3, %v1211_v42  ;;  %v1510_v59 = vpop.permute.xlu0 %1509 }
 0x5d1   : > { %2871 = vmatpush3.bf16.xpose.msra.mxu1 %v1417_v54  ;;  %2872 = vmatprep.mubr.msk.bf16.mxu1 %vm3368_vm0, %v3367_v27 }
 0x5d2   : > { %v1210_v55 = vpack.c.bf16 %v1206_v51, %v1206_v51  ;;  %2882 = vmatprep.subr.bf16.mxu1 %v3367_v27 }
 0x5d4   : > { %2855 = vmatmul.mubr.msk.bf16.vlgmr.msra.gmra.mrb[36].mxu0 %vm723_vm3, %v1210_v55 }
 0x5d5   : > { %2865 = vmatpush3.bf16.msra.mxu0 %v1367_v56  ;;  %2866 = vmatprep.mubr.msk.bf16.mxu0 %vm3368_vm0, %v3367_v27 }
 0x5d6   : > { %2876 = vmatprep.subr.bf16.mxu0 %v3367_v27 }
 0x5d8   : > { %2873 = vmatmul.mubr.msk.bf16.vlgmr.msra.gmra.mrb[32].mxu1 %vm538_vm1, %v1410_v49 }
 0x5d9   : > { %2883 = vmatpush3.bf16.xpose.msra.mxu1 %v1517_v58  ;;  %2884 = vmatprep.mubr.msk.bf16.mxu1 %vm3368_vm0, %v3367_v27 }
 0x5da   : > { %2894 = vmatprep.subr.bf16.mxu1 %v3367_v27 }
 0x5e0   : > { %2885 = vmatmul.mubr.msk.bf16.vlgmr.msra.gmra.mrb[36].mxu1 %vm538_vm1, %v1510_v59 }
 0x5e1   : > { %2896 = vmatprep.mubr.msk.bf16.mxu1 %vm3368_vm0, %v3367_v27 }
 0x5f9   : > { %v1200_v61 = vpop.xlane.xlu1 %1199 }
 0x5fa   : > { %3167 = vrcp.f32 %v1200_v61 }
 0x5fd   : > { %v1460_v0 = vpop.permute.xlu1 %1459 }
 0x601   : > { %v1562_v2 = vpop.permute.xlu1 %1561 }
 0x602   : > { %v1567_v3 = vsel %vm538_vm1, %v1562_v2, 0 }
 0x604   : > { %v3168_v62 = vpop.eup %3167 }
 0x605   : > { %v1208_v50 = vmul.f32 %v3168_v62, %v3160_v19  ;;  %v1560_v4 = vpop.permute.xlu1 %1559 }
 0x607   : > { %v1212_v63 = vpack.c.bf16 %v1208_v50, %v1208_v50 }
 0x609   : > { %2867 = vmatmul.mubr.msk.bf16.vlgmr.msra.gmra.mrb[40].mxu0 %vm723_vm3, %v1212_v63 }
 0x60a   : > { %2877 = vmatpush3.bf16.xpose.msra.mxu0 %v1467_v1  ;;  %2878 = vmatprep.mubr.msk.bf16.mxu0 %vm3368_vm0, %v3367_v27 }
 0x60b   : > { %2888 = vmatprep.subr.bf16.mxu0 %v3367_v27 }
 0x611   : > { %2879 = vmatmul.mubr.msk.bf16.vlgmr.msra.gmra.mrb[44].mxu0 %vm538_vm1, %v1460_v0 }
 0x612   : > { %2889 = vmatpush3.bf16.xpose.msra.mxu0 %v1567_v3  ;;  %2890 = vmatprep.mubr.msk.bf16.mxu0 %vm3368_vm0, %v3367_v27 }
 0x613   : > { %2900 = vmatprep.subr.bf16.mxu0 %v3367_v27 }
 0x619   : > { %2891 = vmatmul.mubr.msk.bf16.vlgmr.msra.gmra.mrb[48].mxu0 %vm538_vm1, %v1560_v4 }
 0x61a   : > { %2902 = vmatprep.mubr.msk.bf16.mxu0 %vm3368_vm0, %v3367_v27 }
 0x66e   : > { %v3808_v5 = vpop.f32.mrb[24].mxu1 }
 0x66f   : > { %v2850_v6 = vpop.f32.mrb[25].mxu1 }
 0x670   : > { %v1259_v7 = vpop.f32.mrb[26].mxu1 }
 0x671   : > { %v2851_v8 = vpop.f32.mrb[27].mxu1 }
 0x6a3   : > { %v3810_v9 = vpop.f32.mrb[28].mxu1 }
 0x6a4   : > { %v2862_v10 = vpop.f32.mrb[29].mxu1 }
 0x6a5   : > { %v1357_v12 = vpop.f32.mrb[30].mxu1 }
 0x6a6   : > { %v2863_v13 = vpop.f32.mrb[31].mxu1 }
 0x6a7   : > { %v3812_v14 = vpop.f32.mrb[36].mxu0 }
 0x6a8   : > { %v3065_v17 = vpack.i.bf16 %v3812_v14, %v3808_v5  ;;  %v2856_v18 = vpop.f32.mrb[37].mxu0 }
 0x6a9   : > { %v1308_v19 = vpop.f32.mrb[38].mxu0 }
 0x6aa   : > { %v2857_v20 = vpop.f32.mrb[39].mxu0 }
 0x6ab   : > { %v1453_v21 = vpop.f32.mrb[32].mxu1 }
 0x6ac   : > { %v2874_v22 = vpop.f32.mrb[33].mxu1  ;;  %v1609_v23 = vsel %vm723_vm3, %v1453_v21, -inf }
 0x6ad   : > { %1610 = vmax.xlane.f32.xlu0 %v1609_v23  ;;  %v1456_v24 = vpop.f32.mrb[34].mxu1 }
 0x6ae   : > { %v2875_v25 = vpop.f32.mrb[35].mxu1 }
 0x6b3   : > { %v1553_v26 = vpop.f32.mrb[36].mxu1 }
 0x6b4   : > { %v2886_v28 = vpop.f32.mrb[37].mxu1  ;;  %v1615_v29 = vsel %vm723_vm3, %v1553_v26, -inf }
 0x6b5   : > { %1616 = vmax.xlane.f32.xlu0 %v1615_v29  ;;  %v1556_v31 = vpop.f32.mrb[38].mxu1 }
 0x6b6   : > { %v2887_v32 = vpop.f32.mrb[39].mxu1 }
 0x6dc   : > { %v3818_v33 = vpop.f32.mrb[40].mxu0 }
 0x6dd   : > { %v3070_v35 = vpack.i.bf16 %v3818_v33, %v3810_v9  ;;  %v2868_v39 = vpop.f32.mrb[41].mxu0 }
 0x6de   : > { %v1406_v40 = vpop.f32.mrb[42].mxu0 }
 0x6df   : > { %v2869_v42 = vpop.f32.mrb[43].mxu0 }
 0x6e4   : > { %v1503_v46 = vpop.f32.mrb[44].mxu0 }
 0x6e5   : > { %v2880_v49 = vpop.f32.mrb[45].mxu0  ;;  %v1612_v51 = vsel %vm723_vm3, %v1503_v46, -inf }
 0x6e6   : > { %1613 = vmax.xlane.f32.xlu1 %v1612_v51  ;;  %v1506_v54 = vpop.f32.mrb[46].mxu0 }
 0x6e7   : > { %v2881_v55 = vpop.f32.mrb[47].mxu0 }
 0x6ec   : > { %v1603_v56 = vpop.f32.mrb[48].mxu0 }
 0x6ed   : > { %v2892_v57 = vpop.f32.mrb[49].mxu0  ;;  %v1618_v58 = vsel %vm723_vm3, %v1603_v56, -inf }
 0x6ee   : > { %1619 = vmax.xlane.f32.xlu0 %v1618_v58  ;;  %v1606_v59 = vpop.f32.mrb[50].mxu0 }
 0x6ef   : > { %v2893_v60 = vpop.f32.mrb[51].mxu0 }
 0x6f7   : > { %1705 = vrot.lane.b32.xlu1 %v3650_v53, %s3370_s23 }
 0x6fb   : > { %1753 = vrot.lane.b32.xlu1 %v3684_v41, %s3370_s23 }
 0x6ff   : > { %1801 = vrot.lane.b32.xlu1 %v3694_v48, %s3370_s23 }
 0x73a   : > { %v1611_v61 = vpop.xlane.xlu0 %1610 }
 0x73b   : > { %v1621_v62 = vsub.f32 %v1453_v21, %v1611_v61 }
 0x73d   : > { %v1625_v50 = vmul.f32 1.442695, %v1621_v62 }
 0x73f   : > { %3169 = vpow2.f32 %v1625_v50 }
 0x742   : > { %v1617_v1 = vpop.xlane.xlu0 %1616 }
 0x743   : > { %v1623_v2 = vsub.f32 %v1553_v26, %v1617_v1 }
 0x745   : > { %v1629_v3 = vmul.f32 1.442695, %v1623_v2 }
 0x747   : > { %3171 = vpow2.f32 %v1629_v3 }
 0x749   : > { %v3170_v63 = vpop.eup %3169 }
 0x74a   : > { %v1633_v0 = vsel %vm723_vm3, %v3170_v63, 0.0 }
 0x74b   : > { %1634 = vadd.xlane.f32.xlu0 %v1633_v0 }
 0x751   : > { %v3172_v12 = vpop.eup %3171 }
 0x752   : > { %v1639_v13 = vsel %vm723_vm3, %v3172_v12, 0.0 }
 0x761   : > { %1657 = vrot.lane.b32.xlu0 %v3648_v52, %s3370_s23 }
 0x773   : > { %v1614_v4 = vpop.xlane.xlu1 %1613 }
 0x774   : > { %v1622_v6 = vsub.f32 %v1503_v46, %v1614_v4 }
 0x776   : > { %v1627_v7 = vmul.f32 1.442695, %v1622_v6 }
 0x777   : > { %v1706_v8 = vpop.permute.xlu1 %1705 }
 0x778   : > { %3173 = vpow2.f32 %v1627_v7  ;;  %v1711_v10 = vsel %vm775_vm2, %v1706_v8, 0 }
 0x779   : > { %2901 = vmatpush3.bf16.msra.mxu0 %v1711_v10 }
 0x77a   : > { %2912 = vmatprep.subr.bf16.mxu0 %v3367_v27 }
 0x77b   : > { %v1620_v20 = vpop.xlane.xlu0 %1619  ;;  %v1754_v25 = vpop.permute.xlu1 %1753 }
 0x77c   : > { %v1624_v21 = vsub.f32 %v1603_v56, %v1620_v20 }
 0x77e   : > { %v1631_v22 = vmul.f32 1.442695, %v1624_v21 }
 0x780   : > { %1640 = vadd.xlane.f32.xlu0 %v1639_v13  ;;  %3175 = vpow2.f32 %v1631_v22 }
 0x782   : > { %v3174_v18 = vpop.eup %3173 }
 0x783   : > { %v1636_v19 = vsel %vm723_vm3, %v3174_v18, 0.0 }
 0x784   : > { %1637 = vadd.xlane.f32.xlu1 %v1636_v19 }
 0x78a   : > { %v3176_v23 = vpop.eup %3175 }
 0x78b   : > { %v1642_v24 = vsel %vm723_vm3, %v3176_v23, 0.0 }
 0x795   : > { %1901 = vrot.lane.b32.xlu1 %v3605_v34, %s3371_s7 }
 0x796   : > { %1851 = vrot.lane.b32.xlu0 %v3600_v30, %s3371_s7 }
 0x79a   : > { %1849 = vrot.lane.b32.xlu0 %v3607_v37, %s3371_s7 }
 0x79e   : > { %1951 = vrot.lane.b32.xlu0 %v3609_v38, %s3371_s7 }
 0x7a2   : > { %1949 = vrot.lane.b32.xlu0 %v3623_v44, %s3371_s7 }
 0x7b9   : > { %1643 = vadd.xlane.f32.xlu1 %v1642_v24 }
 0x7ca   : > { %1899 = vrot.lane.b32.xlu1 %v3625_v45, %s3371_s7  ;;  %v1759_v45 = vsel %vm775_vm2, %v1754_v25, 0 }
 0x7ce   : > { %2001 = vrot.lane.b32.xlu1 %v3617_v43, %s3371_s7  ;;  %v1802_v43 = vpop.permute.xlu1 %1801 }
 0x7cf   : > { %v1807_v54 = vsel %vm775_vm2, %v1802_v43, 0 }
 0x7d2   : > { %1999 = vrot.lane.b32.xlu1 %v3638_v47, %s3371_s7 }
 0x7d8   : > { %v1635_v30 = vpop.xlane.xlu0 %1634 }
 0x7d9   : > { %3177 = vrcp.f32 %v1635_v30 }
 0x7dc   : > { %v1658_v34 = vpop.permute.xlu0 %1657 }
 0x7dd   : > { %v1663_v37 = vsel %vm775_vm2, %v1658_v34, 0 }
 0x7de   : > { %2895 = vmatpush3.bf16.msra.mxu1 %v1663_v37 }
 0x7df   : > { %2906 = vmatprep.subr.bf16.mxu1 %v3367_v27 }
 0x7e3   : > { %v3178_v38 = vpop.eup %3177 }
 0x7e4   : > { %v1649_v44 = vmul.f32 %v3178_v38, %v3170_v63 }
 0x7e6   : > { %v1653_v26 = vpack.c.bf16 %v1649_v44, %v1649_v44 }
 0x7e8   : > { %2897 = vmatmul.mubr.msk.bf16.vlgmr.msra.gmra.mrb[40].mxu1 %vm723_vm3, %v1653_v26 }
 0x7e9   : > { %2907 = vmatpush3.bf16.msra.mxu1 %v1759_v45  ;;  %2908 = vmatprep.mubr.msk.bf16.mxu1 %vm3368_vm0, %v3367_v27 }
 0x7ea   : > { %2918 = vmatprep.subr.bf16.mxu1 %v3367_v27 }
 0x80d   : > { %v1641_v47 = vpop.xlane.xlu0 %1640 }
 0x80e   : > { %3179 = vrcp.f32 %v1641_v47 }
 0x811   : > { %v1638_v28 = vpop.xlane.xlu1 %1637  ;;  %v1852_v29 = vpop.permute.xlu0 %1851 }
 0x812   : > { %3181 = vrcp.f32 %v1638_v28  ;;  %v1857_v49 = vsel %vm538_vm1, %v1852_v29, 0 }
 0x815   : > { %v1850_v42 = vpop.permute.xlu0 %1849  ;;  %v1902_v58 = vpop.permute.xlu1 %1901 }
 0x816   : > { %v1907_v63 = vsel %vm538_vm1, %v1902_v58, 0 }
 0x818   : > { %v3180_v31 = vpop.eup %3179 }
 0x819   : > { %v1651_v32 = vmul.f32 %v3180_v31, %v3172_v12  ;;  %v1952_v55 = vpop.permute.xlu0 %1951 }
 0x81a   : > { %v1957_v56 = vsel %vm538_vm1, %v1952_v55, 0 }
 0x81b   : > { %v1655_v39 = vpack.c.bf16 %v1651_v32, %v1651_v32 }
 0x81c   : > { %v3182_v40 = vpop.eup %3181 }
 0x81d   : > { %v1650_v46 = vmul.f32 %v3182_v40, %v3174_v18  ;;  %2909 = vmatmul.mubr.msk.bf16.vlgmr.msra.gmra.mrb[44].mxu1 %vm723_vm3, %v1655_v39  ;;  %v1950_v57 = vpop.permute.xlu0 %1949 }
 0x81e   : > { %2919 = vmatpush3.bf16.xpose.msra.mxu1 %v1857_v49  ;;  %2920 = vmatprep.mubr.msk.bf16.mxu1 %vm3368_vm0, %v3367_v27 }
 0x81f   : > { %v1654_v51 = vpack.c.bf16 %v1650_v46, %v1650_v46  ;;  %2930 = vmatprep.subr.bf16.mxu1 %v3367_v27 }
 0x821   : > { %2903 = vmatmul.mubr.msk.bf16.vlgmr.msra.gmra.mrb[52].mxu0 %vm723_vm3, %v1654_v51 }
 0x822   : > { %2913 = vmatpush3.bf16.msra.mxu0 %v1807_v54  ;;  %2914 = vmatprep.mubr.msk.bf16.mxu0 %vm3368_vm0, %v3367_v27 }
 0x823   : > { %2924 = vmatprep.subr.bf16.mxu0 %v3367_v27 }
 0x825   : > { %2921 = vmatmul.mubr.msk.bf16.vlgmr.msra.gmra.mrb[48].mxu1 %vm538_vm1, %v1850_v42 }
 0x826   : > { %2931 = vmatpush3.bf16.xpose.msra.mxu1 %v1957_v56  ;;  %2932 = vmatprep.mubr.msk.bf16.mxu1 %vm3368_vm0, %v3367_v27 }
 0x827   : > { %2942 = vmatprep.subr.bf16.mxu1 %v3367_v27 }
 0x82d   : > { %2933 = vmatmul.mubr.msk.bf16.vlgmr.msra.gmra.mrb[52].mxu1 %vm538_vm1, %v1950_v57 }
 0x82e   : > { %2944 = vmatprep.mubr.msk.bf16.mxu1 %vm3368_vm0, %v3367_v27 }
 0x846   : > { %v1644_v59 = vpop.xlane.xlu1 %1643 }
 0x847   : > { %3183 = vrcp.f32 %v1644_v59 }
 0x84a   : > { %v1900_v50 = vpop.permute.xlu1 %1899 }
 0x84e   : > { %v2002_v0 = vpop.permute.xlu1 %2001 }
 0x84f   : > { %v2007_v1 = vsel %vm538_vm1, %v2002_v0, 0 }
 0x851   : > { %v3184_v60 = vpop.eup %3183 }
 0x852   : > { %v1652_v61 = vmul.f32 %v3184_v60, %v3176_v23  ;;  %v2000_v2 = vpop.permute.xlu1 %1999 }
 0x854   : > { %v1656_v62 = vpack.c.bf16 %v1652_v61, %v1652_v61 }
 0x856   : > { %2915 = vmatmul.mubr.msk.bf16.vlgmr.msra.gmra.mrb[56].mxu0 %vm723_vm3, %v1656_v62 }
 0x857   : > { %2925 = vmatpush3.bf16.xpose.msra.mxu0 %v1907_v63  ;;  %2926 = vmatprep.mubr.msk.bf16.mxu0 %vm3368_vm0, %v3367_v27 }
 0x858   : > { %2936 = vmatprep.subr.bf16.mxu0 %v3367_v27 }
 0x85e   : > { %2927 = vmatmul.mubr.msk.bf16.vlgmr.msra.gmra.mrb[60].mxu0 %vm538_vm1, %v1900_v50 }
 0x85f   : > { %2937 = vmatpush3.bf16.xpose.msra.mxu0 %v2007_v1  ;;  %2938 = vmatprep.mubr.msk.bf16.mxu0 %vm3368_vm0, %v3367_v27 }
 0x860   : > { %2948 = vmatprep.subr.bf16.mxu0 %v3367_v27 }
 0x866   : > { %2939 = vmatmul.mubr.msk.bf16.vlgmr.msra.gmra.mrb[64].mxu0 %vm538_vm1, %v2000_v2 }
 0x867   : > { %2950 = vmatprep.mubr.msk.bf16.mxu0 %vm3368_vm0, %v3367_v27 }
 0x8bb   : > { %v1699_v3 = vpop.f32.mrb[40].mxu1 }
 0x8bc   : > { %v2898_v4 = vpop.f32.mrb[41].mxu1 }
 0x8bd   : > { %v1702_v6 = vpop.f32.mrb[42].mxu1 }
 0x8be   : > { %v2899_v7 = vpop.f32.mrb[43].mxu1 }
 0x8f0   : > { %v3892_v8 = vpop.f32.mrb[44].mxu1 }
 0x8f1   : > { %v2910_v10 = vpop.f32.mrb[45].mxu1 }
 0x8f2   : > { %v1798_v12 = vpop.f32.mrb[46].mxu1 }
 0x8f3   : > { %v2911_v13 = vpop.f32.mrb[47].mxu1 }
 0x8f4   : > { %v1747_v18 = vpop.f32.mrb[52].mxu0 }
 0x8f5   : > { %v3075_v19 = vpack.i.bf16 %v1747_v18, %v1699_v3  ;;  %v2904_v20 = vpop.f32.mrb[53].mxu0 }
 0x8f6   : > { %v1750_v21 = vpop.f32.mrb[54].mxu0 }
 0x8f7   : > { %v2905_v22 = vpop.f32.mrb[55].mxu0 }
 0x8f8   : > { %v1893_v23 = vpop.f32.mrb[48].mxu1 }
 0x8f9   : > { %v2922_v24 = vpop.f32.mrb[49].mxu1  ;;  %v2049_v30 = vsel %vm723_vm3, %v1893_v23, -inf }
 0x8fa   : > { %2050 = vmax.xlane.f32.xlu0 %v2049_v30  ;;  %v1896_v34 = vpop.f32.mrb[50].mxu1 }
 0x8fb   : > { %v2923_v37 = vpop.f32.mrb[51].mxu1 }
 0x900   : > { %v1993_v38 = vpop.f32.mrb[52].mxu1 }
 0x901   : > { %v2934_v44 = vpop.f32.mrb[53].mxu1  ;;  %v2055_v25 = vsel %vm723_vm3, %v1993_v38, -inf }
 0x902   : > { %2056 = vmax.xlane.f32.xlu0 %v2055_v25  ;;  %v1996_v26 = vpop.f32.mrb[54].mxu1 }
 0x903   : > { %v2935_v45 = vpop.f32.mrb[55].mxu1 }
 0x929   : > { %v1843_v43 = vpop.f32.mrb[56].mxu0 }
 0x92a   : > { %v3080_v47 = vpack.i.bf16 %v1843_v43, %v3892_v8  ;;  %v2916_v28 = vpop.f32.mrb[57].mxu0 }
 0x92b   : > { %v1846_v29 = vpop.f32.mrb[58].mxu0 }
 0x92c   : > { %v2917_v31 = vpop.f32.mrb[59].mxu0 }
 0x92d   : > { %v3129_v31 = vld [vmem:[#allocation7] sm:$0xff]  }
 0x931   : > { %v1943_v32 = vpop.f32.mrb[60].mxu0 }
 0x932   : > { %v2928_v39 = vpop.f32.mrb[61].mxu0  ;;  %v2052_v40 = vsel %vm723_vm3, %v1943_v32, -inf }
 0x933   : > { %2053 = vmax.xlane.f32.xlu1 %v2052_v40  ;;  %v1946_v42 = vpop.f32.mrb[62].mxu0 }
 0x934   : > { %v2929_v46 = vpop.f32.mrb[63].mxu0  ;;  %v3131_v42 = vld [vmem:[#allocation7 + $0x10] sm:$0xff]  }
 0x939   : > { %v2043_v49 = vpop.f32.mrb[64].mxu0 }
 0x93a   : > { %v2940_v51 = vpop.f32.mrb[65].mxu0  ;;  %v2058_v54 = vsel %vm723_vm3, %v2043_v49, -inf }
 0x93b   : > { %2059 = vmax.xlane.f32.xlu0 %v2058_v54  ;;  %v2046_v55 = vpop.f32.mrb[66].mxu0 }
 0x93c   : > { %v2941_v56 = vpop.f32.mrb[67].mxu0 }
 0x987   : > { %v2051_v57 = vpop.xlane.xlu0 %2050 }
 0x988   : > { %v2061_v58 = vsub.f32 %v1893_v23, %v2051_v57  ;;  %v3132_v57 = vld [vmem:[#allocation7 + $0x18] sm:$0xff]  }
 0x98a   : > { %v2065_v59 = vmul.f32 1.442695, %v2061_v58  ;;  %v3133_v58 = vld [vmem:[#allocation7 + $0x20] sm:$0xff]  }
 0x98c   : > { %3185 = vpow2.f32 %v2065_v59  ;;  %v3134_v59 = vld [vmem:[#allocation7 + $0x28] sm:$0xff]  }
 0x98f   : > { %v2057_v60 = vpop.xlane.xlu0 %2056 }
 0x990   : > { %v2063_v61 = vsub.f32 %v1993_v38, %v2057_v60  ;;  %v3135_v60 = vld [vmem:[#allocation7 + $0x30] sm:$0xff]  }
 0x992   : > { %v2069_v62 = vmul.f32 1.442695, %v2063_v61  ;;  %v3136_v61 = vld [vmem:[#allocation7 + $0x38] sm:$0xff]  }
 0x994   : > { %3187 = vpow2.f32 %v2069_v62 }
 0x996   : > { %v3186_v50 = vpop.eup %3185 }
 0x997   : > { %v2073_v63 = vsel %vm723_vm3, %v3186_v50, 0.0 }
 0x998   : > { %2074 = vadd.xlane.f32.xlu0 %v2073_v63 }
 0x99e   : > { %v3188_v0 = vpop.eup %3187 }
 0x99f   : > { %v2079_v1 = vsel %vm723_vm3, %v3188_v0, 0.0 }
 0x9a0   : > { %2080 = vadd.xlane.f32.xlu0 %v2079_v1 }
 0x9b6   : > { %2097 = vrot.lane.b32.xlu0 %v3648_v52, %s3371_s7 }
 0x9ba   : > { %3066 = vrot.lane.b32.xlu0 %v3065_v17, %s3371_s7 }
 0x9be   : > { %3076 = vrot.lane.b32.xlu0 %v3075_v19, %s3370_s23 }
 0x9c0   : > { %v2054_v2 = vpop.xlane.xlu1 %2053 }
 0x9c1   : > { %v2062_v3 = vsub.f32 %v1943_v32, %v2054_v2  ;;  %v3130_v32 = vld [vmem:[#allocation7 + $0x8] sm:$0xff]  }
 0x9c3   : > { %v2067_v4 = vmul.f32 1.442695, %v2062_v3 }
 0x9c5   : > { %3189 = vpow2.f32 %v2067_v4 }
 0x9c8   : > { %v2060_v52 = vpop.xlane.xlu0 %2059 }
 0x9c9   : > { %v2064_v8 = vsub.f32 %v2043_v49, %v2060_v52 }
 0x9cb   : > { %v2071_v5 = vmul.f32 1.442695, %v2064_v8 }
 0x9cd   : > { %3191 = vpow2.f32 %v2071_v5 }
 0x9cf   : > { %v3190_v6 = vpop.eup %3189 }
 0x9d0   : > { %v2076_v7 = vsel %vm723_vm3, %v3190_v6, 0.0 }
 0x9d1   : > { %2077 = vadd.xlane.f32.xlu1 %v2076_v7 }
 0x9d7   : > { %v3192_v14 = vpop.eup %3191 }
 0x9d8   : > { %v2082_v17 = vsel %vm723_vm3, %v3192_v14, 0.0 }
 0x9e2   : > { %2145 = vrot.lane.b32.xlu1 %v3650_v53, %s3371_s7 }
 0x9e6   : > { %2193 = vrot.lane.b32.xlu1 %v3684_v41, %s3371_s7 }
 0xa0a   : > { %2083 = vadd.xlane.f32.xlu1 %v2082_v17 }
 0xa1b   : > { %2241 = vrot.lane.b32.xlu1 %v3694_v48, %s3371_s7 }
 0xa1f   : > { %3071 = vrot.lane.b32.xlu1 %v3070_v35, %s3371_s7 }
 0xa23   : > { %3081 = vrot.lane.b32.xlu1 %v3080_v47, %s3370_s23 }
 0xa25   : > { %v2075_v53 = vpop.xlane.xlu0 %2074 }
 0xa26   : > { %3193 = vrcp.f32 %v2075_v53 }
 0xa2d   : > { %v2081_v41 = vpop.xlane.xlu0 %2080 }
 0xa2e   : > { %3195 = vrcp.f32 %v2081_v41 }
 0xa30   : > { %v3194_v10 = vpop.eup %3193 }
 0xa31   : > { %v2089_v12 = vmul.f32 %v3194_v10, %v3186_v50  ;;  %v2098_v13 = vpop.permute.xlu0 %2097 }
 0xa32   : > { %v2103_v18 = vsel %vm775_vm2, %v2098_v13, 0 }
 0xa33   : > { %2943 = vmatpush3.bf16.msra.mxu1 %v2103_v18  ;;  %v2093_v19 = vpack.c.bf16 %v2089_v12, %v2089_v12 }
 0xa34   : > { %2954 = vmatprep.subr.bf16.mxu1 %v3367_v27 }
 0xa35   : > { %v3067_v2 = vpop.permute.xlu0 %3066 }
 0xa36   : > { %2945 = vmatmul.mubr.msk.bf16.vlgmr.msra.gmra.mrb[56].mxu1 %vm723_vm3, %v2093_v19  ;;  %v3069_v4 = vunpack.i.h.bf16 %v3067_v2 }
 0xa37   : > { %2956 = vmatprep.mubr.msk.bf16.mxu1 %vm3368_vm0, %v3367_v27 }
 0xa38   : > { %v3196_v9 = vpop.eup %3195  ;;  %v2338_v5 = vsel %vm538_vm1, %v3732_v16, %v3069_v4 }
 0xa39   : > { %v2091_v20 = vmul.f32 %v3196_v9, %v3188_v0  ;;  %v3077_v3 = vpop.permute.xlu0 %3076 }
 0xa3a   : > { %v3079_v7 = vunpack.i.h.bf16 %v3077_v3  ;;  %v3078_v52 = vunpack.i.l.bf16 %v3077_v3 }
 0xa3b   : > { %v2095_v24 = vpack.c.bf16 %v2091_v20, %v2091_v20 }
 0xa3c   : > { %v2343_v10 = vsel %vm2341_vm4, %v2338_v5, %v3079_v7 }
 0xa5e   : > { %v2078_v48 = vpop.xlane.xlu1 %2077 }
 0xa5f   : > { %3197 = vrcp.f32 %v2078_v48 }
 0xa62   : > { %v2146_v33 = vpop.permute.xlu1 %2145 }
 0xa63   : > { %v2151_v35 = vsel %vm775_vm2, %v2146_v33, 0 }
 0xa64   : > { %2949 = vmatpush3.bf16.msra.mxu0 %v2151_v35 }
 0xa65   : > { %2960 = vmatprep.subr.bf16.mxu0 %v3367_v27 }
 0xa66   : > { %v2194_v21 = vpop.permute.xlu1 %2193 }
 0xa67   : > { %v2199_v22 = vsel %vm775_vm2, %v2194_v21, 0 }
 0xa68   : > { %2955 = vmatpush3.bf16.msra.mxu1 %v2199_v22 }
 0xa69   : > { %v3198_v23 = vpop.eup %3197  ;;  %2966 = vmatprep.subr.bf16.mxu1 %v3129_v31 }
 0xa6a   : > { %v2090_v30 = vmul.f32 %v3198_v23, %v3190_v6  ;;  %v3068_v6 = vunpack.i.l.bf16 %v3067_v2 }
 0xa6b   : > { %2957 = vmatmul.mubr.msk.bf16.vlgmr.msra.gmra.mrb[60].mxu1 %vm723_vm3, %v2095_v24 }
 0xa6c   : > { %v2094_v34 = vpack.c.bf16 %v2090_v30, %v2090_v30  ;;  %2967 = vmatpush3.bf16.msra.mxu1 %v3129_v31 }
 0xa6d   : > { %2968 = vmatprep.subr.bf16.mxu1 %v3130_v32 }
 0xa6e   : > { %2951 = vmatmul.mubr.msk.bf16.vlgmr.msra.gmra.mrb[68].mxu0 %vm723_vm3, %v2094_v34 }
 0xa6f   : > { %2962 = vmatprep.mubr.msk.bf16.mxu0 %vm3368_vm0, %v3367_v27 }
 0xa70   : > { %2969 = vmatpush3.bf16.msra.mxu1 %v3130_v32 }
 0xa71   : > { %2970 = vmatprep.subr.bf16.mxu1 %v3131_v42 }
 0xa74   : > { %2971 = vmatpush3.bf16.msra.mxu1 %v3131_v42 }
 0xa75   : > { %2972 = vmatprep.subr.bf16.mxu1 %v3132_v57 }
 0xa78   : > { %2973 = vmatpush3.bf16.msra.mxu1 %v3132_v57 }
 0xa79   : > { %2974 = vmatprep.subr.bf16.mxu1 %v3133_v58 }
 0xa7c   : > { %2975 = vmatpush3.bf16.msra.mxu1 %v3133_v58 }
 0xa7d   : > { %2976 = vmatprep.subr.bf16.mxu1 %v3134_v59 }
 0xa80   : > { %2977 = vmatpush3.bf16.msra.mxu1 %v3134_v59 }
 0xa81   : > { %2978 = vmatprep.subr.bf16.mxu1 %v3135_v60 }
 0xa84   : > { %2979 = vmatpush3.bf16.msra.mxu1 %v3135_v60 }
 0xa85   : > { %2980 = vmatprep.subr.bf16.mxu1 %v3136_v61 }
 0xa88   : > { %2981 = vmatpush3.bf16.msra.mxu1 %v3136_v61 }
 0xa97   : > { %v2084_v37 = vpop.xlane.xlu1 %2083 }
 0xa98   : > { %3199 = vrcp.f32 %v2084_v37 }
 0xa9b   : > { %v2242_v38 = vpop.permute.xlu1 %2241 }
 0xa9c   : > { %v2247_v44 = vsel %vm775_vm2, %v2242_v38, 0 }
 0xa9d   : > { %2961 = vmatpush3.bf16.msra.mxu0 %v2247_v44 }
 0xa9f   : > { %v3072_v19 = vpop.permute.xlu1 %3071 }
 0xaa0   : > { %v3074_v9 = vunpack.i.h.bf16 %v3072_v19  ;;  %v3073_v16 = vunpack.i.l.bf16 %v3072_v19 }
 0xaa2   : > { %v3200_v25 = vpop.eup %3199  ;;  %v2340_v20 = vsel %vm538_vm1, %v3736_v36, %v3074_v9  ;;  %v2339_v21 = vsel %vm538_vm1, %v3730_v15, %v3073_v16  ;;  %v2654_v36 = vld [vmem:[%s4010_s3] ss:$0 sm:$0xff] }
 0xaa3   : > { %v2092_v26 = vmul.f32 %v3200_v25, %v3192_v14  ;;  %v2337_v14 = vsel %vm538_vm1, %v3728_v11, %v3068_v6  ;;  %v3082_v48 = vpop.permute.xlu1 %3081 }
 0xaa4   : > { %v2342_v41 = vsel %vm2341_vm4, %v2337_v14, %v3078_v52  ;;  %v3084_v33 = vunpack.i.h.bf16 %v3082_v48  ;;  %v3083_v35 = vunpack.i.l.bf16 %v3082_v48 }
 0xaa5   : > { %v2096_v45 = vpack.c.bf16 %v2092_v26, %v2092_v26 }
 0xaa6   : > { %v2344_v24 = vsel %vm2341_vm4, %v2339_v21, %v3083_v35  ;;  %v2345_v30 = vsel %vm2341_vm4, %v2340_v20, %v3084_v33 }
 0xaa7   : > { %2963 = vmatmul.mubr.msk.bf16.vlgmr.msra.gmra.mrb[72].mxu0 %vm723_vm3, %v2096_v45 }
 0xb09   : > { %v2139_v43 = vpop.f32.mrb[56].mxu1 }
 0xb0a   : > { %v2946_v47 = vpop.f32.mrb[57].mxu1 }
 0xb0b   : > { %v2142_v28 = vpop.f32.mrb[58].mxu1 }
 0xb0c   : > { %v2947_v29 = vpop.f32.mrb[59].mxu1 }
 0xb3e   : > { %v2235_v39 = vpop.f32.mrb[60].mxu1 }
 0xb3f   : > { %v2958_v27 = vpop.f32.mrb[61].mxu1 }
 0xb40   : > { %v2238_v40 = vpop.f32.mrb[62].mxu1 }
 0xb41   : > { %v2187_v46 = vpop.f32.mrb[68].mxu0  ;;  %v2959_v49 = vpop.f32.mrb[63].mxu1 }
 0xb42   : > { %v3085_v51 = vpack.i.bf16 %v2187_v46, %v2139_v43  ;;  %v2952_v54 = vpop.f32.mrb[69].mxu0 }
 0xb43   : > { %v2190_v55 = vpop.f32.mrb[70].mxu0 }
 0xb44   : > { %3086 = vrot.lane.b32.xlu0 %v3085_v51, %s3369_s21  ;;  %v2953_v56 = vpop.f32.mrb[71].mxu0 }
 0xb7a   : > { %v2283_v62 = vpop.f32.mrb[72].mxu0 }
 0xb7b   : > { %v3090_v50 = vpack.i.bf16 %v2283_v62, %v2235_v39  ;;  %v2964_v63 = vpop.f32.mrb[73].mxu0 }
 0xb7c   : > { %v2286_v0 = vpop.f32.mrb[74].mxu0 }
 0xb7d   : > { %3091 = vrot.lane.b32.xlu1 %v3090_v50, %s3369_s21  ;;  %v2965_v1 = vpop.f32.mrb[75].mxu0 }
 0xbb6   : > { %v3087_v8 = vpop.permute.xlu0 %3086 }
 0xbb7   : > { %v3089_v17 = vunpack.i.h.bf16 %v3087_v8  ;;  %v3088_v53 = vunpack.i.l.bf16 %v3087_v8 }
 0xbb9   : > { %v2347_v12 = vsel %vm2346_vm5, %v2342_v41, %v3088_v53  ;;  %v2348_v13 = vsel %vm2346_vm5, %v2343_v10, %v3089_v17 }
 0xbba   : > { %v2351_v18 = vpack.c.bf16 %v2348_v13, %v2347_v12 }
 0xbbc   : > { %2982 = vmatprep.mubr.bf16.mxu1 %v2351_v18 }
 0xbef   : > { %v3092_v11 = vpop.permute.xlu1 %3091 }
 0xbf0   : > { %v3094_v22 = vunpack.i.h.bf16 %v3092_v11  ;;  %v3093_v23 = vunpack.i.l.bf16 %v3092_v11 }
 0xbf2   : > { %v2350_v34 = vsel %vm2346_vm5, %v2345_v30, %v3094_v22  ;;  %v2349_v37 = vsel %vm2346_vm5, %v2344_v24, %v3093_v23 }
 0xbf3   : > { %v2352_v38 = vpack.c.bf16 %v2350_v34, %v2349_v37 }
 0xbf5   : > { %2983 = vmatmul.mubr.bf16.vlgmr.msra.gmra.mrb[64].mxu1 %v2352_v38 }
 0xcc8   : > { %v2984_v15 = vpop.f32.mrb[64].mxu1 }
 0xcc9   : > { %v2467_v44 = vadd.f32 %v2984_v15, %v2654_v36  ;;  %v2458_v25 = vpop.f32.mrb[65].mxu1 }
 0xcca   : > { %v2459_v26 = vadd.f32 %v2654_v36, %v2458_v25  ;;  %v2985_v45 = vpop.f32.mrb[66].mxu1 }
 0xccb   : > { %2475 = vst [vmem:[%s244_s25 + $0x10] sm:$0xff] %v2467_v44  ;;  %v2470_v43 = vadd.f32 %v2985_v45, %v2654_v36  ;;  %v2461_v47 = vpop.f32.mrb[67].mxu1 }
 0xccc   : > { %2473 = vst [vmem:[%s244_s25] sm:$0xff] %v2459_v26  ;;  %v2462_v28 = vadd.f32 %v2654_v36, %v2461_v47 }
 0xccd   : > { %2476 = vst [vmem:[%s244_s25 + $0x18] sm:$0xff] %v2470_v43 }
 0xcce   : > { %2474 = vst [vmem:[%s244_s25 + $0x8] sm:$0xff] %v2462_v28 }
 0xccf   : > { %3300 = shalt.err (!%p3297_p2)
}
 0xcd0   : > { %s3301_s21 = scalar_lea.hbm %s3963_s5, 512  ;;  %s3305_s8 = scalar_lea.hbm %s4011_s4, 1024 }
 0xcd1   : > { %p3302_p13 = scmp.ne.s32.totalorder %s3963_s5, %s3301_s21  ;;  %p3306_p4 = scmp.lt.u32.totalorder %s3963_s5, %s4011_s4 }
 0xcd2   : > { %p3307_p7 = scmp.lt.u32.totalorder %s3305_s8, %s3301_s21  ;;  %p3309_p11 = scmp.lt.u32.totalorder %s3301_s21, %s3963_s5 }
 0xcd3   : > { %p3303_p6 = pnand %p3302_p13, %p4025_p0 }
 0xcd4   : > { %p3308_p8 = por %p3307_p7, %p3306_p4 }
 0xcd5   : > { %p3304_p10 = pneg %p3303_p6 }
 0xcd6   : > { %p3310_p1 = por %p3309_p11, %p3308_p8 }
 0xcd8   : > { %p3311_p3 = pnand %p3310_p1, %p3304_p10 }
 0xcda   : > { %3314 = shalt.err (!%p3311_p3)
}
 0xcdb   : > { %s3373_s25 = smov 128   ;;  %s3374_s27 = smov 8  }
 0xcdc   : > { %2996 = dma.vmem_to_hbm [thread:$0]  (%p4025_p0), %s3958_s9, 512, %s3963_s5, %s2478_s19, %s3373_s25, %s3373_s25, %s3374_s27  }
 0xcdd PF: > { %s2506_s20 = sand.u32 1, %s3345_s15   ;;  %p4026_p5 = scmp.ne.s32.totalorder %s4016_s22, 0 }
 0xcde   : > { %p4027_p9 = scmp.ge.s32.totalorder %s3357_s18, 2  ;;  %s2507_s29 = scalar_lea.sflag [#allocation4], %s2506_s20 }
 0xce0   : > { %p3010_p12 = pnand %p4027_p9, %p4026_p5 }
 0xce2   : > { %3340 = dma.done.wait (!%p3010_p12), %s2507_s29, 512  }
 0xce3   : > { %3342 = vsyncadd (!%p3010_p12), %s2507_s29, 4294966784  ;;  %p18_p2 = scmp.ge.s32.totalorder %s3513_s11, 4   ;;  %s4028_s15 = smov %s3349_s16 }
 0xce4   : > { %s4029_s16 = smov %s3353_s17  ;;  %s4030_s17 = smov %s3522_s14 }
 0xce5   : > { %s4031_s18 = smov %s3513_s11  ;;  %20 = sbr.rel (!%p18_p2) target bundleno = 6 (0x6), region = 89 }
 0xcec   :  { %2512 = vsyncpa [#allocation3], 1 }
 0xced   :  { %2514 = vsyncpa [#allocation3 + $0x1], 1 }
 0xcee   :  { %2515 = vsyncpa [#allocation6], 1 }
 0xcef   :  { %2516 = vsyncpa [#allocation4], 1 }
 0xcf0   :  { %2518 = vsyncpa [#allocation4 + $0x1], 1 }

</bundles_post_ra>
